<compile_context>
chip_gen: v6e
topology: v6e:2x2x1
jax: 0.10.0
libtpu: 0.0.40
codegen_flags: <defaults>
</compile_context>

<pallas_src>
import jax
import jax.numpy as jnp
from jax.experimental import pallas as pl
from jax.experimental.pallas import tpu as pltpu


def _meanpool_conv1x1_kernel(x_ref, w_ref, b_ref, o_ref, acc_ref):
    # x_ref:   [1, tk, HW]   one batch element, one Cin chunk (producer dtype)
    # w_ref:   [Cout, tk]    bf16, pre-scaled by 1/HW
    # b_ref:   [1, Cout]     f32
    # o_ref:   [1, 1, Cout]  f32 (lane-dense)
    # acc_ref: [Cout, HW]    f32 VMEM accumulator (persists across k)
    k = pl.program_id(1)

    @pl.when(k == 0)
    def _init():
        acc_ref[...] = jnp.zeros_like(acc_ref)

    x = x_ref[0]                                   # [tk, HW]
    if x.dtype != jnp.bfloat16:                    # static: skip if already bf16
        x = x.astype(jnp.bfloat16)
    # MXU: [Cout, tk] @ [tk, HW] -> [Cout, HW], f32 accumulation.
    acc_ref[...] += jnp.dot(w_ref[...], x, preferred_element_type=jnp.float32)

    @pl.when(k == pl.num_programs(1) - 1)
    def _finalize():
        cout = acc_ref.shape[0]
        # sum over HW (1/HW already folded into W), then store lane-dense.
        row = jnp.sum(acc_ref[...], axis=1).reshape(1, cout)   # [1, Cout]
        o_ref[0] = row + b_ref[...]


def mean_conv2d_1x1(x_nchw, weight, bias, *, k_split=2):
    """x_nchw: [B, Cin, H, W]; weight: [Cout, Cin, 1, 1]; bias: [Cout].
    Returns [B, Cout, 1, 1] (float32), matching the PyTorch module."""
    B, Cin, H, W = x_nchw.shape
    Cout = weight.shape[0]
    HW = H * W

    # K-split the contraction axis so the DMA of chunk k+1 hides behind the
    # matmul of chunk k.  Fall back to a single chunk if the split would
    # violate the (8, 128) block constraints.  (Sweepable: {1, 2, 3}.)
    if Cin % k_split != 0 or (Cin // k_split) % 128 != 0:
        k_split = 1
    tk = Cin // k_split

    # Keep the producer's dtype & layout (no transpose, no forced upcast);
    # just flatten the spatial dims (free, contiguous reshape).
    x_flat = x_nchw.reshape(B, Cin, HW)
    # Fold the 1/HW mean scale into the weight; ship it as bf16 (halves W DMA).
    # TODO(synk): optional fp8 (v7x) / int8 (v5e/v6e) weight with per-channel
    # scale would shave another ~25% of HBM bytes; accuracy-gated, not taken.
    w_scaled = (weight.reshape(Cout, Cin).astype(jnp.float32) * (1.0 / HW)
                ).astype(jnp.bfloat16)                       # [Cout, Cin] native layout
    b_row = bias.reshape(1, Cout).astype(jnp.float32)

    x_bytes = x_flat.size * x_flat.dtype.itemsize
    w_bytes = w_scaled.size * w_scaled.dtype.itemsize
    io_bytes = x_bytes + w_bytes + b_row.size * 4 + B * Cout * 4

    out = pl.pallas_call(
        _meanpool_conv1x1_kernel,
        out_shape=jax.ShapeDtypeStruct((B, 1, Cout), jnp.float32),
        grid_spec=pltpu.PrefetchScalarGridSpec(
            num_scalar_prefetch=0,
            grid=(B, k_split),
            in_specs=[
                pl.BlockSpec((1, tk, HW), lambda b, k: (b, k, 0)),   # x chunk
                pl.BlockSpec((Cout, tk), lambda b, k: (0, k)),       # W chunk
                # bias index_map is constant -> DMA'd once; a Buffered(1) hint
                # would only save its 384 B second buffer, skipped.
                pl.BlockSpec((1, Cout), lambda b, k: (0, 0)),
            ],
            out_specs=pl.BlockSpec((1, 1, Cout), lambda b, k: (b, 0, 0)),
            scratch_shapes=[pltpu.VMEM((Cout, HW), jnp.float32)],
        ),
        compiler_params=pltpu.CompilerParams(
            dimension_semantics=("parallel", "arbitrary")),
        cost_estimate=pl.CostEstimate(
            flops=2 * B * Cout * Cin * HW,
            bytes_accessed=io_bytes,
            transcendentals=0),
    )(x_flat, w_scaled, b_row)

    return out.reshape(B, Cout, 1, 1)


if __name__ == "__main__":
    # Shapes implied by the module: x760 is [1, 2304, 7, 7], Conv2d(2304 -> 96, 1x1).
    B, Cin, H, W = 1, 2304, 7, 7
    Cout = 96

    key = jax.random.PRNGKey(0)
    kx, kw, kb = jax.random.split(key, 3)
    x = jax.random.normal(kx, (B, Cin, H, W), dtype=jnp.float32)
    # Deterministic synthetic parameters (shapes from Conv2d(2304, 96, 1)).
    weight = jax.random.normal(kw, (Cout, Cin, 1, 1), dtype=jnp.float32) * 0.02
    bias = jax.random.normal(kb, (Cout,), dtype=jnp.float32) * 0.02

    y = mean_conv2d_1x1(x, weight, bias)
    jax.block_until_ready(y)

    # Reference (plain JAX, f32) for sanity check.
    mean_ref = jnp.mean(x, axis=(2, 3))                       # [B, Cin]
    y_ref = (mean_ref @ weight.reshape(Cout, Cin).T + bias).reshape(B, Cout, 1, 1)

    assert y.shape == (B, Cout, 1, 1)
    # bf16 weight/activation matmul with f32 accumulation -> relaxed tolerance.
    max_err = jnp.max(jnp.abs(y - y_ref))
    assert jnp.allclose(y, y_ref, atol=1e-2, rtol=3e-2), f"max abs err {max_err}"

    print("KERNEL_OK")
</pallas_src>

<mosaic_0001>
module attributes {stable_mosaic.version = 11 : i64} {
  func.func @_meanpool_conv1x1_kernel(%arg0: i32, %arg1: i32, %arg2: memref<1x1152x49xf32, #tpu.memory_space<vmem>>, %arg3: memref<96x1152xbf16, #tpu.memory_space<vmem>>, %arg4: memref<1x96xf32, #tpu.memory_space<vmem>>, %arg5: memref<1x1x96xf32, #tpu.memory_space<vmem>>, %arg6: memref<96x49xf32, #tpu.memory_space<vmem>>) attributes {dimension_semantics = [#tpu.dimension_semantics<parallel>, #tpu.dimension_semantics<arbitrary>], iteration_bounds = array<i64: 1, 2>, scalar_prefetch = 0 : i64, scratch_operands = 1 : i64, tpu.core_type = #tpu.core_type<tc>, window_params = [{transform_indices = @transform_0, window_bounds = array<i64: 1, 1152, 49>}, {transform_indices = @transform_1, window_bounds = array<i64: 96, 1152>}, {pipeline_mode = #tpu.pipeline_mode<synchronous>, transform_indices = @transform_2, window_bounds = array<i64: 1, 96>}, {transform_indices = @transform_3, window_bounds = array<i64: 1, 1, 96>}]} {
    %c0_i32 = arith.constant 0 : i32
    %0 = arith.cmpi eq, %arg1, %c0_i32 : i32
    %1 = arith.extui %0 : i1 to i32
    %c0_i32_0 = arith.constant 0 : i32
    %2 = arith.cmpi ne, %1, %c0_i32_0 : i32
    scf.if %2 {
      %cst_10 = arith.constant 0.000000e+00 : f32
      %14 = vector.broadcast %cst_10 : f32 to vector<96x49xf32>
      %c0_11 = arith.constant 0 : index
      %c0_12 = arith.constant 0 : index
      %15 = vector.load %arg6[%c0_11, %c0_12] : memref<96x49xf32, #tpu.memory_space<vmem>>, vector<96x49xf32>
      tpu.vector_store %arg6[%c0_11, %c0_12], %14 {strides = array<i32>} : memref<96x49xf32, #tpu.memory_space<vmem>>, vector<96x49xf32>,
    } else {
    }
    %c0 = arith.constant 0 : index
    %c0_1 = arith.constant 0 : index
    %c0_2 = arith.constant 0 : index
    %3 = vector.load %arg2[%c0, %c0_1, %c0_2] : memref<1x1152x49xf32, #tpu.memory_space<vmem>>, vector<1x1152x49xf32>
    %4 = vector.shape_cast %3 : vector<1x1152x49xf32> to vector<1152x49xf32>
    %5 = arith.truncf %4 : vector<1152x49xf32> to vector<1152x49xbf16>
    %c0_3 = arith.constant 0 : index
    %c0_4 = arith.constant 0 : index
    %6 = vector.load %arg6[%c0_3, %c0_4] : memref<96x49xf32, #tpu.memory_space<vmem>>, vector<96x49xf32>
    %c0_5 = arith.constant 0 : index
    %c0_6 = arith.constant 0 : index
    %7 = vector.load %arg3[%c0_5, %c0_6] : memref<96x1152xbf16, #tpu.memory_space<vmem>>, vector<96x1152xbf16>
    %cst = arith.constant dense<0.000000e+00> : vector<96x49xf32>
    %8 = tpu.matmul %7, %5, %cst {dimension_numbers = #tpu.dot_dimension_numbers<[1], [0], [0], [1], [0, 0, 1, 1], [], []>} : vector<96x1152xbf16>, vector<1152x49xbf16>, vector<96x49xf32> -> vector<96x49xf32>
    %9 = arith.addf %6, %8 : vector<96x49xf32>
    %c0_7 = arith.constant 0 : index
    %c0_8 = arith.constant 0 : index
    %10 = vector.load %arg6[%c0_7, %c0_8] : memref<96x49xf32, #tpu.memory_space<vmem>>, vector<96x49xf32>
    tpu.vector_store %arg6[%c0_7, %c0_8], %9 {strides = array<i32>} : memref<96x49xf32, #tpu.memory_space<vmem>>, vector<96x49xf32>,
    %c1_i32 = arith.constant 1 : i32
    %11 = arith.cmpi eq, %arg1, %c1_i32 : i32
    %12 = arith.extui %11 : i1 to i32
    %c0_i32_9 = arith.constant 0 : i32
    %13 = arith.cmpi ne, %12, %c0_i32_9 : i32
    scf.if %13 {
      %c0_10 = arith.constant 0 : index
      %c0_11 = arith.constant 0 : index
      %14 = vector.load %arg6[%c0_10, %c0_11] : memref<96x49xf32, #tpu.memory_space<vmem>>, vector<96x49xf32>
      %cst_12 = arith.constant dense<0.000000e+00> : vector<96xf32>
      %15 = vector.multi_reduction <add>, %14, %cst_12 [1] : vector<96x49xf32> to vector<96xf32>
      %16 = vector.shape_cast %15 : vector<96xf32> to vector<1x96xf32>
      %c0_13 = arith.constant 0 : index
      %c0_14 = arith.constant 0 : index
      %17 = vector.load %arg4[%c0_13, %c0_14] : memref<1x96xf32, #tpu.memory_space<vmem>>, vector<1x96xf32>
      %18 = arith.addf %16, %17 : vector<1x96xf32>
      %c0_15 = arith.constant 0 : index
      %c0_16 = arith.constant 0 : index
      %c0_17 = arith.constant 0 : index
      %19 = vector.load %arg5[%c0_15, %c0_16, %c0_17] : memref<1x1x96xf32, #tpu.memory_space<vmem>>, vector<1x1x96xf32>
      %20 = vector.shape_cast %19 : vector<1x1x96xf32> to vector<1x96xf32>
      %21 = vector.shape_cast %18 : vector<1x96xf32> to vector<1x1x96xf32>
      tpu.vector_store %arg5[%c0_15, %c0_16, %c0_17], %21 {strides = array<i32>} : memref<1x1x96xf32, #tpu.memory_space<vmem>>, vector<1x1x96xf32>,
    } else {
    }
    return
  }
  func.func @transform_0(%arg0: i32, %arg1: i32) -> (i32, i32, i32) {
    %c0_i32 = arith.constant 0 : i32
    %c0_i32_0 = arith.constant 0 : i32
    return %arg0, %arg1, %c0_i32 : i32, i32, i32
  }
  func.func @transform_1(%arg0: i32, %arg1: i32) -> (i32, i32) {
    %c0_i32 = arith.constant 0 : i32
    %c0_i32_0 = arith.constant 0 : i32
    return %c0_i32, %arg1 : i32, i32
  }
  func.func @transform_2(%arg0: i32, %arg1: i32) -> (i32, i32) {
    %c0_i32 = arith.constant 0 : i32
    %c0_i32_0 = arith.constant 0 : i32
    %c0_i32_1 = arith.constant 0 : i32
    return %c0_i32, %c0_i32_0 : i32, i32
  }
  func.func @transform_3(%arg0: i32, %arg1: i32) -> (i32, i32, i32) {
    %c0_i32 = arith.constant 0 : i32
    %c0_i32_0 = arith.constant 0 : i32
    %c0_i32_1 = arith.constant 0 : i32
    return %arg0, %c0_i32, %c0_i32_0 : i32, i32, i32
  }
}

</mosaic_0001>

<bundles_post_ra>
// kernel: tpu_custom_call.1
= control target key start
LH: loop header
LB: loop body
LE: loop exit
PB: predicated region body
PF: predicated region fallthrough
CT: control target
= control target key end

     0   :  { %8 = vsyncpa [#allocation5], 0  ;;  %s2301_s12 = smov 0   ;;  %s2303_s13 = smov 0   ;;  %s2828_s0 = inlined_call_operand.vmem [shape: f32[1,2304,49], index: 0, kind: input, shape index: {}]   ;;  %s2829_s1 = inlined_call_operand.vmem [shape: bf16[96,2304], index: 1, kind: input, shape index: {}]   ;;  %s2830_s2 = inlined_call_operand.vmem [shape: f32[1,96], index: 2, kind: input, shape index: {}]   ;;  %s2831_s3 = inlined_call_operand.hbm [shape: f32[1,1,96], index: 3, kind: output, shape index: {}]  }
   0x1   :  { %s2305_s14 = smov 0   ;;  %s2307_s15 = smov 0  }
   0x2   :  { %s2309_s16 = smov 0  }
   0x3 LB: > { %s1721_s17 = sadd.s32 4294967295, %s2276_s16   ;;  %s23_s18 = sadd.s32 1, %s2272_s15  ;;  %s2276_s16 = sphi %s2309_s16, %s14_s16   ;;  %s2272_s15 = sphi %s2307_s15, %s2854_s15   ;;  %s2268_s14 = sphi %s2305_s14, %s2853_s14   ;;  %s2264_s13 = sphi %s2303_s13, %s2852_s13   ;;  %s2260_s12 = sphi %s2301_s12, %s2851_s12  }
   0x4   : > { %p24_p0 = scmp.ge.s32.totalorder %s23_s18, 2  ;;  %p68_p1 = scmp.ne.s32.totalorder %s2264_s13, %s2260_s12 }
   0x5   : > { %p69_p2 = scmp.eq.s32.totalorder %s2276_s16, 0  ;;  %s61_s20 = sadd.s32 1, %s2264_s13 }
   0x6   : > { %s2856_s18 = smov (%p24_p0, %s23_s18), 0  ;;  %p1723_p5 = scmp.ge.s32.totalorder %s2276_s16, 2 }
   0x7   : > { %p70_p3 = por %p69_p2, %p68_p1  ;;  %s58_s19 = ssub.s32 %s2272_s15, %s2856_s18 }
   0x8   : > { %p59_p4 = scmp.eq.s32.totalorder %s58_s19, 0  ;;  %144 = sbr.rel (%p1723_p5) target bundleno = 50 (0x32), region = 20 }
   0xa   : > { %s2337_s21 = scalar_select %p59_p4, %s2264_s13, %s61_s20  }
   0xd   : > { %160 = sbr.rel (!%p70_p3) target bundleno = 50 (0x32), region = 28  ;;  %s162_s22 = sand.u32 (%p70_p3), 1, %s2264_s13  }
   0xe   : > { %s1812_s23 = smul.u32 (%p70_p3), 36, %s2272_s15 }
   0xf   : > { %s2079_s24 = smul.u32 (%p70_p3), 432, %s162_s22 }
  0x10   : > { %s2345_s27 = scalar_lea.vmem (%p70_p3), %s2829_s1, %s1812_s23 }
  0x11   : > { %v182_v0 = vld [vmem:[%s2345_s27] sm:$0xff] (%p70_p3)  ;;  %v184_v1 = vld [vmem:[%s2345_s27 + $0x8] sm:$0xff] (%p70_p3)  ;;  %v186_v2 = vld [vmem:[%s2345_s27 + $0x10] sm:$0xff] (%p70_p3)  ;;  %s2350_s28 = scalar_lea.vmem (%p70_p3), [#allocation3], %s2079_s24 }
  0x12   : > { %183 = vst [vmem:[%s2350_s28] sm:$0xff] %v182_v0  ;;  %185 = vst [vmem:[%s2350_s28 + $0x8] sm:$0xff] %v184_v1  ;;  %v188_v3 = vld [vmem:[%s2345_s27 + $0x18] sm:$0xff]  ;;  %v190_v4 = vld [vmem:[%s2345_s27 + $0x48] sm:$0xff] }
  0x13   : > { %187 = vst [vmem:[%s2350_s28 + $0x10] sm:$0xff] %v186_v2  ;;  %v192_v5 = vld [vmem:[%s2345_s27 + $0x50] sm:$0xff]  ;;  %189 = vst [vmem:[%s2350_s28 + $0x18] sm:$0xff] %v188_v3  ;;  %v194_v6 = vld [vmem:[%s2345_s27 + $0x58] sm:$0xff] }
  0x14   : > { %191 = vst [vmem:[%s2350_s28 + $0x24] sm:$0xff] %v190_v4  ;;  %193 = vst [vmem:[%s2350_s28 + $0x2c] sm:$0xff] %v192_v5  ;;  %v196_v7 = vld [vmem:[%s2345_s27 + $0x60] sm:$0xff]  ;;  %v198_v8 = vld [vmem:[%s2345_s27 + $0x90] sm:$0xff] }
  0x15   : > { %195 = vst [vmem:[%s2350_s28 + $0x34] sm:$0xff] %v194_v6  ;;  %197 = vst [vmem:[%s2350_s28 + $0x3c] sm:$0xff] %v196_v7  ;;  %v200_v9 = vld [vmem:[%s2345_s27 + $0x98] sm:$0xff]  ;;  %v202_v10 = vld [vmem:[%s2345_s27 + $0xa0] sm:$0xff] }
  0x16   : > { %199 = vst [vmem:[%s2350_s28 + $0x48] sm:$0xff] %v198_v8  ;;  %v204_v11 = vld [vmem:[%s2345_s27 + $0xa8] sm:$0xff]  ;;  %201 = vst [vmem:[%s2350_s28 + $0x50] sm:$0xff] %v200_v9  ;;  %v206_v12 = vld [vmem:[%s2345_s27 + $0xd8] sm:$0xff] }
  0x17   : > { %203 = vst [vmem:[%s2350_s28 + $0x58] sm:$0xff] %v202_v10  ;;  %205 = vst [vmem:[%s2350_s28 + $0x60] sm:$0xff] %v204_v11  ;;  %v208_v13 = vld [vmem:[%s2345_s27 + $0xe0] sm:$0xff]  ;;  %v210_v14 = vld [vmem:[%s2345_s27 + $0xe8] sm:$0xff] }
  0x18   : > { %207 = vst [vmem:[%s2350_s28 + $0x6c] sm:$0xff] %v206_v12  ;;  %209 = vst [vmem:[%s2350_s28 + $0x74] sm:$0xff] %v208_v13  ;;  %v212_v15 = vld [vmem:[%s2345_s27 + $0xf0] sm:$0xff]  ;;  %v214_v16 = vld [vmem:[%s2345_s27 + $0x120] sm:$0xff] }
  0x19   : > { %211 = vst [vmem:[%s2350_s28 + $0x7c] sm:$0xff] %v210_v14  ;;  %v216_v17 = vld [vmem:[%s2345_s27 + $0x128] sm:$0xff]  ;;  %213 = vst [vmem:[%s2350_s28 + $0x84] sm:$0xff] %v212_v15  ;;  %v218_v18 = vld [vmem:[%s2345_s27 + $0x130] sm:$0xff] }
  0x1a   : > { %215 = vst [vmem:[%s2350_s28 + $0x90] sm:$0xff] %v214_v16  ;;  %217 = vst [vmem:[%s2350_s28 + $0x98] sm:$0xff] %v216_v17  ;;  %v220_v19 = vld [vmem:[%s2345_s27 + $0x138] sm:$0xff]  ;;  %v222_v20 = vld [vmem:[%s2345_s27 + $0x168] sm:$0xff] }
  0x1b   : > { %219 = vst [vmem:[%s2350_s28 + $0xa0] sm:$0xff] %v218_v18  ;;  %221 = vst [vmem:[%s2350_s28 + $0xa8] sm:$0xff] %v220_v19  ;;  %v224_v21 = vld [vmem:[%s2345_s27 + $0x170] sm:$0xff]  ;;  %v226_v22 = vld [vmem:[%s2345_s27 + $0x178] sm:$0xff] }
  0x1c   : > { %223 = vst [vmem:[%s2350_s28 + $0xb4] sm:$0xff] %v222_v20  ;;  %v228_v23 = vld [vmem:[%s2345_s27 + $0x180] sm:$0xff]  ;;  %225 = vst [vmem:[%s2350_s28 + $0xbc] sm:$0xff] %v224_v21  ;;  %v230_v24 = vld [vmem:[%s2345_s27 + $0x1b0] sm:$0xff] }
  0x1d   : > { %227 = vst [vmem:[%s2350_s28 + $0xc4] sm:$0xff] %v226_v22  ;;  %229 = vst [vmem:[%s2350_s28 + $0xcc] sm:$0xff] %v228_v23  ;;  %v232_v25 = vld [vmem:[%s2345_s27 + $0x1b8] sm:$0xff]  ;;  %v234_v26 = vld [vmem:[%s2345_s27 + $0x1c0] sm:$0xff] }
  0x1e   : > { %231 = vst [vmem:[%s2350_s28 + $0xd8] sm:$0xff] %v230_v24  ;;  %233 = vst [vmem:[%s2350_s28 + $0xe0] sm:$0xff] %v232_v25  ;;  %v236_v27 = vld [vmem:[%s2345_s27 + $0x1c8] sm:$0xff]  ;;  %v238_v28 = vld [vmem:[%s2345_s27 + $0x1f8] sm:$0xff] }
  0x1f   : > { %235 = vst [vmem:[%s2350_s28 + $0xe8] sm:$0xff] %v234_v26  ;;  %v240_v29 = vld [vmem:[%s2345_s27 + $0x200] sm:$0xff]  ;;  %237 = vst [vmem:[%s2350_s28 + $0xf0] sm:$0xff] %v236_v27  ;;  %v242_v30 = vld [vmem:[%s2345_s27 + $0x208] sm:$0xff] }
  0x20   : > { %239 = vst [vmem:[%s2350_s28 + $0xfc] sm:$0xff] %v238_v28  ;;  %241 = vst [vmem:[%s2350_s28 + $0x104] sm:$0xff] %v240_v29  ;;  %v244_v31 = vld [vmem:[%s2345_s27 + $0x210] sm:$0xff]  ;;  %v246_v32 = vld [vmem:[%s2345_s27 + $0x240] sm:$0xff] }
  0x21   : > { %243 = vst [vmem:[%s2350_s28 + $0x10c] sm:$0xff] %v242_v30  ;;  %245 = vst [vmem:[%s2350_s28 + $0x114] sm:$0xff] %v244_v31  ;;  %v248_v33 = vld [vmem:[%s2345_s27 + $0x248] sm:$0xff]  ;;  %v250_v34 = vld [vmem:[%s2345_s27 + $0x250] sm:$0xff] }
  0x22   : > { %247 = vst [vmem:[%s2350_s28 + $0x120] sm:$0xff] %v246_v32  ;;  %v252_v35 = vld [vmem:[%s2345_s27 + $0x258] sm:$0xff]  ;;  %249 = vst [vmem:[%s2350_s28 + $0x128] sm:$0xff] %v248_v33  ;;  %v254_v36 = vld [vmem:[%s2345_s27 + $0x288] sm:$0xff] }
  0x23   : > { %251 = vst [vmem:[%s2350_s28 + $0x130] sm:$0xff] %v250_v34  ;;  %253 = vst [vmem:[%s2350_s28 + $0x138] sm:$0xff] %v252_v35  ;;  %v256_v37 = vld [vmem:[%s2345_s27 + $0x290] sm:$0xff]  ;;  %v258_v38 = vld [vmem:[%s2345_s27 + $0x298] sm:$0xff] }
  0x24   : > { %255 = vst [vmem:[%s2350_s28 + $0x144] sm:$0xff] %v254_v36  ;;  %257 = vst [vmem:[%s2350_s28 + $0x14c] sm:$0xff] %v256_v37  ;;  %v260_v39 = vld [vmem:[%s2345_s27 + $0x2a0] sm:$0xff]  ;;  %v262_v40 = vld [vmem:[%s2345_s27 + $0x2d0] sm:$0xff] }
  0x25   : > { %259 = vst [vmem:[%s2350_s28 + $0x154] sm:$0xff] %v258_v38  ;;  %v264_v41 = vld [vmem:[%s2345_s27 + $0x2d8] sm:$0xff]  ;;  %261 = vst [vmem:[%s2350_s28 + $0x15c] sm:$0xff] %v260_v39  ;;  %v266_v42 = vld [vmem:[%s2345_s27 + $0x2e0] sm:$0xff] }
  0x26   : > { %263 = vst [vmem:[%s2350_s28 + $0x168] sm:$0xff] %v262_v40  ;;  %265 = vst [vmem:[%s2350_s28 + $0x170] sm:$0xff] %v264_v41  ;;  %v268_v43 = vld [vmem:[%s2345_s27 + $0x2e8] sm:$0xff]  ;;  %v270_v44 = vld [vmem:[%s2345_s27 + $0x318] sm:$0xff] }
  0x27   : > { %267 = vst [vmem:[%s2350_s28 + $0x178] sm:$0xff] %v266_v42  ;;  %269 = vst [vmem:[%s2350_s28 + $0x180] sm:$0xff] %v268_v43  ;;  %v272_v45 = vld [vmem:[%s2345_s27 + $0x320] sm:$0xff]  ;;  %v274_v46 = vld [vmem:[%s2345_s27 + $0x328] sm:$0xff] }
  0x28   : > { %271 = vst [vmem:[%s2350_s28 + $0x18c] sm:$0xff] %v270_v44  ;;  %v276_v47 = vld [vmem:[%s2345_s27 + $0x330] sm:$0xff]  ;;  %273 = vst [vmem:[%s2350_s28 + $0x194] sm:$0xff] %v272_v45  ;;  %v1725_v48 = vld [vmem:[%s2345_s27 + $0x20] sm:$0xf] }
  0x29   : > { %275 = vst [vmem:[%s2350_s28 + $0x19c] sm:$0xff] %v274_v46  ;;  %277 = vst [vmem:[%s2350_s28 + $0x1a4] sm:$0xff] %v276_v47  ;;  %v1727_v49 = vld [vmem:[%s2345_s27 + $0x68] sm:$0xf]  ;;  %v1729_v50 = vld [vmem:[%s2345_s27 + $0xb0] sm:$0xf] }
  0x2a   : > { %1726 = vst [vmem:[%s2350_s28 + $0x20] sm:$0xf] %v1725_v48  ;;  %1728 = vst [vmem:[%s2350_s28 + $0x44] sm:$0xf] %v1727_v49  ;;  %v1731_v51 = vld [vmem:[%s2345_s27 + $0xf8] sm:$0xf] }
  0x2b   : > { %1730 = vst [vmem:[%s2350_s28 + $0x68] sm:$0xf] %v1729_v50  ;;  %v1733_v52 = vld [vmem:[%s2345_s27 + $0x140] sm:$0xf]  ;;  %v1735_v53 = vld [vmem:[%s2345_s27 + $0x188] sm:$0xf] }
  0x2c   : > { %1732 = vst [vmem:[%s2350_s28 + $0x8c] sm:$0xf] %v1731_v51  ;;  %1734 = vst [vmem:[%s2350_s28 + $0xb0] sm:$0xf] %v1733_v52  ;;  %v1737_v54 = vld [vmem:[%s2345_s27 + $0x1d0] sm:$0xf] }
  0x2d   : > { %1736 = vst [vmem:[%s2350_s28 + $0xd4] sm:$0xf] %v1735_v53  ;;  %v1739_v55 = vld [vmem:[%s2345_s27 + $0x218] sm:$0xf]  ;;  %v1741_v56 = vld [vmem:[%s2345_s27 + $0x260] sm:$0xf] }
  0x2e   : > { %1738 = vst [vmem:[%s2350_s28 + $0xf8] sm:$0xf] %v1737_v54  ;;  %1740 = vst [vmem:[%s2350_s28 + $0x11c] sm:$0xf] %v1739_v55  ;;  %v1743_v57 = vld [vmem:[%s2345_s27 + $0x2a8] sm:$0xf] }
  0x2f   : > { %1742 = vst [vmem:[%s2350_s28 + $0x140] sm:$0xf] %v1741_v56  ;;  %v1745_v58 = vld [vmem:[%s2345_s27 + $0x2f0] sm:$0xf]  ;;  %v1747_v59 = vld [vmem:[%s2345_s27 + $0x338] sm:$0xf] }
  0x30   : > { %1744 = vst [vmem:[%s2350_s28 + $0x164] sm:$0xf] %v1743_v57  ;;  %1746 = vst [vmem:[%s2350_s28 + $0x188] sm:$0xf] %v1745_v58 }
  0x31   : > { %1748 = vst [vmem:[%s2350_s28 + $0x1ac] sm:$0xf] %v1747_v59 }
  0x32 PF: > { %p1749_p6 = scmp.ge.s32.totalorder %s2276_s16, 1  ;;  %p314_p7 = scmp.lt.s32.totalorder %s2276_s16, 3 }
  0x34   : > { %p315_p8 = pnand %p1749_p6, %p314_p7 }
  0x36   : > { %318 = sbr.rel (%p315_p8) target bundleno = 752 (0x2f0), region = 54 }
  0x3b   : > { %s321_s29 = sand.u32 1, %s2260_s12   ;;  %s348_s30 = smul.u32 144, %s2268_s14 }
  0x3c   : > { %s2080_s4 = smul.u32 432, %s321_s29  ;;  %p1751_p10 = scmp.ne.s32.totalorder %s2268_s14, 0 }
  0x3d   : > { %p351_p9 = scmp.lt.s32.totalorder %s348_s30, 287 }
  0x3e   : > { %s2478_s9 = scalar_lea.vmem [#allocation3], %s2080_s4  ;;  %363 = sbr.rel (%p1751_p10) target bundleno = 74 (0x4a), region = 62 }
  0x3f   : > { %s2858_s30 = smov (!%p351_p9, %s348_s30), 287 }
  0x40   : > { %s1750_s5 = sshll.u32 %s2858_s30, 3 }
  0x41   : > { %s2476_s8 = scalar_lea.vmem %s2828_s0, %s1750_s5 }
  0x43   : > { %vm364_vm0 = vcmask 400384   ;;  %v2278_v60 = vmov 0.0  }
  0x44   : > { %365 = vst.msk [vmem:[#allocation2] sm:$0xff] %vm364_vm0, %v2278_v60  ;;  %366 = vst.msk [vmem:[#allocation2 + $0x8] sm:$0xff] %vm364_vm0, %v2278_v60 }
  0x45   : > { %367 = vst.msk [vmem:[#allocation2 + $0x10] sm:$0xff] %vm364_vm0, %v2278_v60  ;;  %368 = vst.msk [vmem:[#allocation2 + $0x18] sm:$0xff] %vm364_vm0, %v2278_v60 }
  0x46   : > { %369 = vst.msk [vmem:[#allocation2 + $0x20] sm:$0xff] %vm364_vm0, %v2278_v60  ;;  %370 = vst.msk [vmem:[#allocation2 + $0x28] sm:$0xff] %vm364_vm0, %v2278_v60 }
  0x47   : > { %371 = vst.msk [vmem:[#allocation2 + $0x30] sm:$0xff] %vm364_vm0, %v2278_v60  ;;  %372 = vst.msk [vmem:[#allocation2 + $0x38] sm:$0xff] %vm364_vm0, %v2278_v60 }
  0x48   : > { %373 = vst.msk [vmem:[#allocation2 + $0x40] sm:$0xff] %vm364_vm0, %v2278_v60  ;;  %374 = vst.msk [vmem:[#allocation2 + $0x48] sm:$0xff] %vm364_vm0, %v2278_v60 }
  0x49   : > { %375 = vst.msk [vmem:[#allocation2 + $0x50] sm:$0xff] %vm364_vm0, %v2278_v60  ;;  %376 = vst.msk [vmem:[#allocation2 + $0x58] sm:$0xff] %vm364_vm0, %v2278_v60 }
  0x4a PF: > { %v407_v61 = vld [vmem:[%s2476_s8 + $0xf0] sm:$0xff]  ;;  %v408_v62 = vld [vmem:[%s2476_s8 + $0xf8] sm:$0xff]  ;;  %v405_v8 = vld [vmem:[%s2476_s8 + $0xe0] sm:$0xff]  ;;  %vm1358_vm1 = vcmask 400384   ;;  %p1806_p11 = scmp.ne.s32.totalorder %s2268_s14, 1 }
  0x4b   : > { %v439_v63 = vld [vmem:[%s2476_s8 + $0x1f0] sm:$0xff]  ;;  %v536_v0 = vpack.c.bf16 %v408_v62, %v407_v61  ;;  %v440_v1 = vld [vmem:[%s2476_s8 + $0x1f8] sm:$0xff]  ;;  %v406_v10 = vld [vmem:[%s2476_s8 + $0xe8] sm:$0xff] }
  0x4c   : > { %v391_v2 = vld [vmem:[%s2476_s8 + $0x70] sm:$0xff]  ;;  %v392_v3 = vld [vmem:[%s2476_s8 + $0x78] sm:$0xff]  ;;  %v552_v4 = vpack.c.bf16 %v440_v1, %v439_v63  ;;  %v437_v11 = vld [vmem:[%s2476_s8 + $0x1e0] sm:$0xff]  ;;  %v535_v13 = vpack.c.bf16 %v406_v10, %v405_v8 }
  0x4d   : > { %v528_v5 = vpack.c.bf16 %v392_v3, %v391_v2  ;;  %v423_v6 = vld [vmem:[%s2476_s8 + $0x170] sm:$0xff]  ;;  %v424_v7 = vld [vmem:[%s2476_s8 + $0x178] sm:$0xff]  ;;  %1813 = vmatprep.subr.bf16.mxu0 %v536_v0  ;;  %v438_v12 = vld [vmem:[%s2476_s8 + $0x1e8] sm:$0xff] }
  0x4e   : > { %v544_v9 = vpack.c.bf16 %v424_v7, %v423_v6  ;;  %1865 = vmatprep.subr.bf16.mxu1 %v552_v4  ;;  %v551_v14 = vpack.c.bf16 %v438_v12, %v437_v11  ;;  %v389_v15 = vld [vmem:[%s2476_s8 + $0x60] sm:$0xff]  ;;  %v390_v16 = vld [vmem:[%s2476_s8 + $0x68] sm:$0xff]  ;;  %v403_v20 = vld [vmem:[%s2476_s8 + $0xd0] sm:$0xff] }
  0x4f   : > { %1814 = vmatpush3.bf16.msra.mxu0 %v528_v5  ;;  %v421_v17 = vld [vmem:[%s2476_s8 + $0x160] sm:$0xff]  ;;  %v527_v18 = vpack.c.bf16 %v390_v16, %v389_v15  ;;  %v422_v19 = vld [vmem:[%s2476_s8 + $0x168] sm:$0xff]  ;;  %v404_v21 = vld [vmem:[%s2476_s8 + $0xd8] sm:$0xff] }
  0x50   : > { %1866 = vmatpush3.bf16.msra.mxu1 %v544_v9  ;;  %1815 = vmatprep.subr.bf16.mxu0 %v535_v13  ;;  %v543_v22 = vpack.c.bf16 %v422_v19, %v421_v17  ;;  %v534_v23 = vpack.c.bf16 %v404_v21, %v403_v20  ;;  %v435_v24 = vld [vmem:[%s2476_s8 + $0x1d0] sm:$0xff]  ;;  %v436_v25 = vld [vmem:[%s2476_s8 + $0x1d8] sm:$0xff]  ;;  %v401_v32 = vld [vmem:[%s2476_s8 + $0xc0] sm:$0xff] }
  0x51   : > { %1867 = vmatprep.subr.bf16.mxu1 %v551_v14  ;;  %v387_v26 = vld [vmem:[%s2476_s8 + $0x50] sm:$0xff]  ;;  %v550_v27 = vpack.c.bf16 %v436_v25, %v435_v24  ;;  %v388_v28 = vld [vmem:[%s2476_s8 + $0x58] sm:$0xff]  ;;  %v402_v33 = vld [vmem:[%s2476_s8 + $0xc8] sm:$0xff] }
  0x52   : > { %v419_v29 = vld [vmem:[%s2476_s8 + $0x150] sm:$0xff]  ;;  %v420_v30 = vld [vmem:[%s2476_s8 + $0x158] sm:$0xff]  ;;  %v526_v31 = vpack.c.bf16 %v388_v28, %v387_v26  ;;  %v433_v34 = vld [vmem:[%s2476_s8 + $0x1c0] sm:$0xff]  ;;  %v533_v36 = vpack.c.bf16 %v402_v33, %v401_v32 }
  0x53   : > { %1816 = vmatpush3.bf16.msra.mxu0 %v527_v18  ;;  %v542_v35 = vpack.c.bf16 %v420_v30, %v419_v29  ;;  %v434_v37 = vld [vmem:[%s2476_s8 + $0x1c8] sm:$0xff]  ;;  %v385_v38 = vld [vmem:[%s2476_s8 + $0x40] sm:$0xff]  ;;  %v399_v43 = vld [vmem:[%s2476_s8 + $0xb0] sm:$0xff] }
  0x54   : > { %1868 = vmatpush3.bf16.msra.mxu1 %v543_v22  ;;  %1817 = vmatprep.subr.bf16.mxu0 %v534_v23  ;;  %v386_v39 = vld [vmem:[%s2476_s8 + $0x48] sm:$0xff]  ;;  %v549_v40 = vpack.c.bf16 %v434_v37, %v433_v34  ;;  %v417_v41 = vld [vmem:[%s2476_s8 + $0x140] sm:$0xff]  ;;  %v400_v44 = vld [vmem:[%s2476_s8 + $0xb8] sm:$0xff] }
  0x55   : > { %1869 = vmatprep.subr.bf16.mxu1 %v550_v27  ;;  %v418_v42 = vld [vmem:[%s2476_s8 + $0x148] sm:$0xff]  ;;  %v431_v45 = vld [vmem:[%s2476_s8 + $0x1b0] sm:$0xff]  ;;  %v432_v46 = vld [vmem:[%s2476_s8 + $0x1b8] sm:$0xff]  ;;  %v525_v47 = vpack.c.bf16 %v386_v39, %v385_v38  ;;  %v532_v49 = vpack.c.bf16 %v400_v44, %v399_v43 }
  0x56   : > { %v541_v48 = vpack.c.bf16 %v418_v42, %v417_v41  ;;  %v383_v50 = vld [vmem:[%s2476_s8 + $0x30] sm:$0xff]  ;;  %v384_v51 = vld [vmem:[%s2476_s8 + $0x38] sm:$0xff]  ;;  %v548_v53 = vpack.c.bf16 %v432_v46, %v431_v45  ;;  %v397_v55 = vld [vmem:[%s2476_s8 + $0xa0] sm:$0xff] }
  0x57   : > { %1818 = vmatpush3.bf16.msra.mxu0 %v526_v31  ;;  %v415_v52 = vld [vmem:[%s2476_s8 + $0x130] sm:$0xff]  ;;  %v416_v54 = vld [vmem:[%s2476_s8 + $0x138] sm:$0xff]  ;;  %v398_v56 = vld [vmem:[%s2476_s8 + $0xa8] sm:$0xff]  ;;  %v524_v59 = vpack.c.bf16 %v384_v51, %v383_v50 }
  0x58   : > { %1870 = vmatpush3.bf16.msra.mxu1 %v542_v35  ;;  %1819 = vmatprep.subr.bf16.mxu0 %v533_v36  ;;  %v429_v57 = vld [vmem:[%s2476_s8 + $0x1a0] sm:$0xff]  ;;  %v430_v58 = vld [vmem:[%s2476_s8 + $0x1a8] sm:$0xff]  ;;  %v540_v61 = vpack.c.bf16 %v416_v54, %v415_v52  ;;  %v531_v62 = vpack.c.bf16 %v398_v56, %v397_v55  ;;  %v395_v3 = vld [vmem:[%s2476_s8 + $0x90] sm:$0xff] }
  0x59   : > { %1871 = vmatprep.subr.bf16.mxu1 %v549_v40  ;;  %v381_v60 = vld [vmem:[%s2476_s8 + $0x20] sm:$0xff]  ;;  %v382_v63 = vld [vmem:[%s2476_s8 + $0x28] sm:$0xff]  ;;  %v547_v2 = vpack.c.bf16 %v430_v58, %v429_v57  ;;  %v396_v4 = vld [vmem:[%s2476_s8 + $0x98] sm:$0xff] }
  0x5a   : > { %v413_v0 = vld [vmem:[%s2476_s8 + $0x120] sm:$0xff]  ;;  %v414_v1 = vld [vmem:[%s2476_s8 + $0x128] sm:$0xff]  ;;  %v427_v5 = vld [vmem:[%s2476_s8 + $0x190] sm:$0xff]  ;;  %v523_v9 = vpack.c.bf16 %v382_v63, %v381_v60  ;;  %v530_v14 = vpack.c.bf16 %v396_v4, %v395_v3 }
  0x5b   : > { %1820 = vmatpush3.bf16.msra.mxu0 %v525_v47  ;;  %v428_v6 = vld [vmem:[%s2476_s8 + $0x198] sm:$0xff]  ;;  %v379_v7 = vld [vmem:[%s2476_s8 + $0x10] sm:$0xff]  ;;  %v393_v12 = vld [vmem:[%s2476_s8 + $0x80] sm:$0xff]  ;;  %v539_v13 = vpack.c.bf16 %v414_v1, %v413_v0 }
  0x5c   : > { %1872 = vmatpush3.bf16.msra.mxu1 %v541_v48  ;;  %1821 = vmatprep.subr.bf16.mxu0 %v532_v49  ;;  %v380_v8 = vld [vmem:[%s2476_s8 + $0x18] sm:$0xff]  ;;  %v411_v10 = vld [vmem:[%s2476_s8 + $0x110] sm:$0xff]  ;;  %v394_v15 = vld [vmem:[%s2476_s8 + $0x88] sm:$0xff]  ;;  %v546_v16 = vpack.c.bf16 %v428_v6, %v427_v5 }
  0x5d   : > { %1873 = vmatprep.subr.bf16.mxu1 %v548_v53  ;;  %v412_v11 = vld [vmem:[%s2476_s8 + $0x118] sm:$0xff]  ;;  %v425_v17 = vld [vmem:[%s2476_s8 + $0x180] sm:$0xff]  ;;  %v426_v19 = vld [vmem:[%s2476_s8 + $0x188] sm:$0xff]  ;;  %v522_v21 = vpack.c.bf16 %v380_v8, %v379_v7  ;;  %v529_v24 = vpack.c.bf16 %v394_v15, %v393_v12 }
  0x5e   : > { %v2132_v18 = vld [vmem:[%s2478_s9 + $0x4] ss:$36 sps:$4 sm:$0xff]   ;;  %v2135_v20 = vld [vmem:[%s2478_s9 + $0xc] ss:$36 sps:$4 sm:$0xff]   ;;  %v538_v23 = vpack.c.bf16 %v412_v11, %v411_v10  ;;  %v545_v28 = vpack.c.bf16 %v426_v19, %v425_v17  ;;  %v2138_v44 = vld [vmem:[%s2478_s9 + $0x54] ss:$36 sps:$4 sm:$0xff]  }
  0x5f   : > { %1822 = vmatpush3.bf16.msra.mxu0 %v524_v59  ;;  %v377_v22 = vld [vmem:[%s2476_s8] sm:$0xff]  ;;  %973 = vmatprep.mubr.bf16.mxu0 %v2132_v18  ;;  %v378_v25 = vld [vmem:[%s2476_s8 + $0x8] sm:$0xff]  ;;  %v503_v29 = vld [vmem:[%s2476_s8 + $0x3f0] sm:$0xff] }
  0x60   : > { %1874 = vmatpush3.bf16.msra.mxu1 %v540_v61  ;;  %1823 = vmatprep.subr.bf16.mxu0 %v531_v62  ;;  %v409_v26 = vld [vmem:[%s2476_s8 + $0x100] sm:$0xff]  ;;  %v410_v27 = vld [vmem:[%s2476_s8 + $0x108] sm:$0xff]  ;;  %v504_v30 = vld [vmem:[%s2476_s8 + $0x3f8] sm:$0xff]  ;;  %v521_v31 = vpack.c.bf16 %v378_v25, %v377_v22 }
  0x61   : > { %1875 = vmatprep.subr.bf16.mxu1 %v547_v2  ;;  %1054 = vmatprep.mubr.bf16.mxu1 %v2135_v20  ;;  %v487_v32 = vld [vmem:[%s2476_s8 + $0x370] sm:$0xff]  ;;  %v537_v33 = vpack.c.bf16 %v410_v27, %v409_v26  ;;  %v488_v35 = vld [vmem:[%s2476_s8 + $0x378] sm:$0xff]  ;;  %v584_v39 = vpack.c.bf16 %v504_v30, %v503_v29  ;;  %v501_v40 = vld [vmem:[%s2476_s8 + $0x3e0] sm:$0xff] }
  0x62   : > { %v2130_v34 = vld [vmem:[%s2478_s9] ss:$36 sps:$4 sm:$0xff]   ;;  %v472_v37 = vld [vmem:[%s2476_s8 + $0x2f8] sm:$0xff]  ;;  %v502_v41 = vld [vmem:[%s2476_s8 + $0x3e8] sm:$0xff]  ;;  %v576_v49 = vpack.c.bf16 %v488_v35, %v487_v32 }
  0x63   : > { %1824 = vmatpush3.bf16.msra.mxu0 %v523_v9  ;;  %v471_v36 = vld [vmem:[%s2476_s8 + $0x2f0] sm:$0xff]  ;;  %v2133_v38 = vld [vmem:[%s2478_s9 + $0x8] ss:$36 sps:$4 sm:$0xff]   ;;  %v469_v47 = vld [vmem:[%s2476_s8 + $0x2e0] sm:$0xff]  ;;  %v583_v51 = vpack.c.bf16 %v502_v41, %v501_v40 }
  0x64   : > { %1876 = vmatpush3.bf16.msra.mxu1 %v539_v13  ;;  %1825 = vmatprep.subr.bf16.mxu0 %v530_v14  ;;  %v2136_v42 = vld [vmem:[%s2478_s9 + $0x4c] ss:$36 sps:$4 sm:$0xff]   ;;  %v568_v43 = vpack.c.bf16 %v472_v37, %v471_v36  ;;  %v2142_v9 = vld [vmem:[%s2478_s9 + $0x94] ss:$36 sps:$4 sm:$0xff]   ;;  %v2144_v11 = vld [vmem:[%s2478_s9 + $0x9c] ss:$36 sps:$4 sm:$0xff]  }
  0x65   : > { %1877 = vmatprep.subr.bf16.mxu1 %v546_v16  ;;  %v455_v45 = vld [vmem:[%s2476_s8 + $0x270] sm:$0xff]  ;;  %v456_v46 = vld [vmem:[%s2476_s8 + $0x278] sm:$0xff]  ;;  %v470_v48 = vld [vmem:[%s2476_s8 + $0x2e8] sm:$0xff] }
  0x66   : > { %v485_v50 = vld [vmem:[%s2476_s8 + $0x360] sm:$0xff]  ;;  %v486_v52 = vld [vmem:[%s2476_s8 + $0x368] sm:$0xff]  ;;  %v560_v53 = vpack.c.bf16 %v456_v46, %v455_v45  ;;  %v499_v54 = vld [vmem:[%s2476_s8 + $0x3d0] sm:$0xff]  ;;  %v567_v56 = vpack.c.bf16 %v470_v48, %v469_v47 }
  0x67   : > { %1826 = vmatpush3.bf16.msra.mxu0 %v522_v21  ;;  %v500_v55 = vld [vmem:[%s2476_s8 + $0x3d8] sm:$0xff]  ;;  %v453_v57 = vld [vmem:[%s2476_s8 + $0x260] sm:$0xff]  ;;  %v454_v58 = vld [vmem:[%s2476_s8 + $0x268] sm:$0xff]  ;;  %v575_v61 = vpack.c.bf16 %v486_v52, %v485_v50 }
  0x68   : > { %1878 = vmatpush3.bf16.msra.mxu1 %v538_v23  ;;  %1827 = vmatprep.subr.bf16.mxu0 %v529_v24  ;;  %v483_v59 = vld [vmem:[%s2476_s8 + $0x350] sm:$0xff]  ;;  %v484_v60 = vld [vmem:[%s2476_s8 + $0x358] sm:$0xff]  ;;  %v497_v63 = vld [vmem:[%s2476_s8 + $0x3c0] sm:$0xff]  ;;  %v582_v2 = vpack.c.bf16 %v500_v55, %v499_v54  ;;  %v559_v3 = vpack.c.bf16 %v454_v58, %v453_v57 }
  0x69   : > { %1879 = vmatprep.subr.bf16.mxu1 %v545_v28  ;;  %v2140_v62 = vld [vmem:[%s2478_s9 + $0x48] ss:$36 sps:$4 sm:$0xff]   ;;  %v467_v0 = vld [vmem:[%s2476_s8 + $0x2d0] sm:$0xff]  ;;  %v574_v10 = vpack.c.bf16 %v484_v60, %v483_v59  ;;  %v481_v12 = vld [vmem:[%s2476_s8 + $0x340] sm:$0xff] }
  0x6a   : > { %v468_v1 = vld [vmem:[%s2476_s8 + $0x2d8] sm:$0xff]  ;;  %v498_v4 = vld [vmem:[%s2476_s8 + $0x3c8] sm:$0xff]  ;;  %v451_v5 = vld [vmem:[%s2476_s8 + $0x250] sm:$0xff] }
  0x6b   : > { %1828 = vmatpush3.bf16.msra.mxu0 %v521_v31  ;;  %v566_v6 = vpack.c.bf16 %v468_v1, %v467_v0  ;;  %v452_v7 = vld [vmem:[%s2476_s8 + $0x258] sm:$0xff]  ;;  %v2141_v8 = vld [vmem:[%s2478_s9 + $0x50] ss:$36 sps:$4 sm:$0xff]   ;;  %v482_v13 = vld [vmem:[%s2476_s8 + $0x348] sm:$0xff]  ;;  %v581_v14 = vpack.c.bf16 %v498_v4, %v497_v63 }
  0x6c   : > { %1880 = vmatpush3.bf16.msra.mxu1 %v537_v33  ;;  %1917 = vmatprep.subr.bf16.mxu0 %v568_v43  ;;  %v558_v15 = vpack.c.bf16 %v452_v7, %v451_v5  ;;  %v495_v16 = vld [vmem:[%s2476_s8 + $0x3b0] sm:$0xff]  ;;  %v496_v17 = vld [vmem:[%s2476_s8 + $0x3b8] sm:$0xff]  ;;  %v465_v18 = vld [vmem:[%s2476_s8 + $0x2c0] sm:$0xff]  ;;  %v573_v24 = vpack.c.bf16 %v482_v13, %v481_v12 }
  0x6d   : > { %1969 = vmatprep.subr.bf16.mxu1 %v584_v39  ;;  %v466_v19 = vld [vmem:[%s2476_s8 + $0x2c8] sm:$0xff]  ;;  %v449_v20 = vld [vmem:[%s2476_s8 + $0x240] sm:$0xff]  ;;  %v580_v27 = vpack.c.bf16 %v496_v17, %v495_v16  ;;  %v479_v28 = vld [vmem:[%s2476_s8 + $0x330] sm:$0xff] }
  0x6e   : > { %974 = vmatmul.mubr.bf16.vlgmr.msra.gmra.mxu0 %v2130_v34  ;;  %v450_v21 = vld [vmem:[%s2476_s8 + $0x248] sm:$0xff]  ;;  %v565_v22 = vpack.c.bf16 %v466_v19, %v465_v18  ;;  %v2146_v23 = vld [vmem:[%s2478_s9 + $0x90] ss:$36 sps:$4 sm:$0xff]   ;;  %v480_v29 = vld [vmem:[%s2476_s8 + $0x338] sm:$0xff] }
  0x6f   : > { %1055 = vmatmul.mubr.bf16.vlgmr.msra.gmra.mxu1 %v2133_v38  ;;  %981 = vmatprep.mubr.bf16.mxu0 %v2136_v42  ;;  %v2147_v25 = vld [vmem:[%s2478_s9 + $0x98] ss:$36 sps:$4 sm:$0xff]   ;;  %v557_v30 = vpack.c.bf16 %v450_v21, %v449_v20  ;;  %v2150_v31 = vld [vmem:[%s2478_s9 + $0xe4] ss:$36 sps:$4 sm:$0xff]   ;;  %v572_v37 = vpack.c.bf16 %v480_v29, %v479_v28  ;;  %v2160_v20 = vld [vmem:[%s2478_s9 + $0x16c] ss:$36 sps:$4 sm:$0xff]  }
  0x70   : > { %1970 = vmatpush3.bf16.msra.mxu1 %v576_v49  ;;  %1062 = vmatprep.mubr.bf16.mxu1 %v2138_v44  ;;  %v2148_v26 = vld [vmem:[%s2478_s9 + $0xdc] ss:$36 sps:$4 sm:$0xff]   ;;  %v2159_v19 = vld [vmem:[%s2478_s9 + $0x128] ss:$36 sps:$4 sm:$0xff]   ;;  %v2162_v21 = vld [vmem:[%s2478_s9 + $0x174] ss:$36 sps:$4 sm:$0xff]  }
  0x71   : > { %1971 = vmatprep.subr.bf16.mxu1 %v583_v51  ;;  %1918 = vmatpush3.bf16.msra.mxu0 %v560_v53  ;;  %v493_v32 = vld [vmem:[%s2476_s8 + $0x3a0] sm:$0xff]  ;;  %v494_v33 = vld [vmem:[%s2476_s8 + $0x3a8] sm:$0xff]  ;;  %v463_v34 = vld [vmem:[%s2476_s8 + $0x2b0] sm:$0xff] }
  0x72   : > { %1919 = vmatprep.subr.bf16.mxu0 %v567_v56  ;;  %v464_v35 = vld [vmem:[%s2476_s8 + $0x2b8] sm:$0xff]  ;;  %v447_v36 = vld [vmem:[%s2476_s8 + $0x230] sm:$0xff]  ;;  %v461_v40 = vld [vmem:[%s2476_s8 + $0x2a0] sm:$0xff]  ;;  %v579_v42 = vpack.c.bf16 %v494_v33, %v493_v32 }
  0x73   : > { %v564_v38 = vpack.c.bf16 %v464_v35, %v463_v34  ;;  %v448_v39 = vld [vmem:[%s2476_s8 + $0x238] sm:$0xff]  ;;  %v462_v41 = vld [vmem:[%s2476_s8 + $0x2a8] sm:$0xff]  ;;  %v477_v43 = vld [vmem:[%s2476_s8 + $0x320] sm:$0xff] }
  0x74   : > { %1972 = vmatpush3.bf16.msra.mxu1 %v575_v61  ;;  %v478_v44 = vld [vmem:[%s2476_s8 + $0x328] sm:$0xff]  ;;  %v556_v45 = vpack.c.bf16 %v448_v39, %v447_v36  ;;  %v491_v46 = vld [vmem:[%s2476_s8 + $0x390] sm:$0xff]  ;;  %v563_v47 = vpack.c.bf16 %v462_v41, %v461_v40  ;;  %v492_v48 = vld [vmem:[%s2476_s8 + $0x398] sm:$0xff] }
  0x75   : > { %1973 = vmatprep.subr.bf16.mxu1 %v582_v2  ;;  %1920 = vmatpush3.bf16.msra.mxu0 %v559_v3  ;;  %v445_v49 = vld [vmem:[%s2476_s8 + $0x220] sm:$0xff]  ;;  %v446_v50 = vld [vmem:[%s2476_s8 + $0x228] sm:$0xff]  ;;  %v571_v52 = vpack.c.bf16 %v478_v44, %v477_v43  ;;  %v578_v54 = vpack.c.bf16 %v492_v48, %v491_v46  ;;  %v475_v56 = vld [vmem:[%s2476_s8 + $0x310] sm:$0xff] }
  0x76   : > { %982 = vmatmul.mubr.bf16.gmra.mxu0 %v2140_v62  ;;  %1921 = vmatprep.subr.bf16.mxu0 %v566_v6  ;;  %v2152_v51 = vld [vmem:[%s2478_s9 + $0xd8] ss:$36 sps:$4 sm:$0xff]   ;;  %v2153_v53 = vld [vmem:[%s2478_s9 + $0xe0] ss:$36 sps:$4 sm:$0xff]   ;;  %v555_v55 = vpack.c.bf16 %v446_v50, %v445_v49  ;;  %v2156_v2 = vld [vmem:[%s2478_s9 + $0x12c] ss:$36 sps:$4 sm:$0xff]  }
  0x77   : > { %1063 = vmatmul.mubr.bf16.gmra.mxu1 %v2141_v8  ;;  %989 = vmatprep.mubr.bf16.mxu0 %v2142_v9  ;;  %v476_v57 = vld [vmem:[%s2476_s8 + $0x318] sm:$0xff]  ;;  %v459_v58 = vld [vmem:[%s2476_s8 + $0x290] sm:$0xff]  ;;  %v489_v0 = vld [vmem:[%s2476_s8 + $0x380] sm:$0xff] }
  0x78   : > { %1974 = vmatpush3.bf16.msra.mxu1 %v574_v10  ;;  %1070 = vmatprep.mubr.bf16.mxu1 %v2144_v11  ;;  %v460_v59 = vld [vmem:[%s2476_s8 + $0x298] sm:$0xff]  ;;  %v443_v60 = vld [vmem:[%s2476_s8 + $0x210] sm:$0xff]  ;;  %v490_v1 = vld [vmem:[%s2476_s8 + $0x388] sm:$0xff]  ;;  %v570_v3 = vpack.c.bf16 %v476_v57, %v475_v56 }
  0x79   : > { %1975 = vmatprep.subr.bf16.mxu1 %v581_v14  ;;  %1922 = vmatpush3.bf16.msra.mxu0 %v558_v15  ;;  %v444_v61 = vld [vmem:[%s2476_s8 + $0x218] sm:$0xff]  ;;  %v562_v63 = vpack.c.bf16 %v460_v59, %v459_v58  ;;  %v457_v4 = vld [vmem:[%s2476_s8 + $0x280] sm:$0xff]  ;;  %v458_v5 = vld [vmem:[%s2476_s8 + $0x288] sm:$0xff]  ;;  %v577_v7 = vpack.c.bf16 %v490_v1, %v489_v0 }
  0x7a   : > { %1923 = vmatprep.subr.bf16.mxu0 %v565_v22  ;;  %v2154_v62 = vld [vmem:[%s2478_s9 + $0x124] ss:$36 sps:$4 sm:$0xff]   ;;  %v554_v6 = vpack.c.bf16 %v444_v61, %v443_v60  ;;  %v561_v10 = vpack.c.bf16 %v458_v5, %v457_v4  ;;  %v2176_v36 = vld [vmem:[%s2478_s9 + $0x58] ss:$36 sps:$4 sm:$0xff]   ;;  %v2180_v41 = vld [vmem:[%s2478_s9 + $0xac] ss:$36 sps:$4 sm:$0xff]  }
  0x7b   : > { %v473_v8 = vld [vmem:[%s2476_s8 + $0x300] sm:$0xff]  ;;  %v474_v9 = vld [vmem:[%s2476_s8 + $0x308] sm:$0xff]  ;;  %v519_v14 = vld [vmem:[%s2476_s8 + $0x470] sm:$0xff] }
  0x7c   : > { %1976 = vmatpush3.bf16.msra.mxu1 %v573_v24  ;;  %v441_v11 = vld [vmem:[%s2476_s8 + $0x200] sm:$0xff]  ;;  %v442_v12 = vld [vmem:[%s2476_s8 + $0x208] sm:$0xff]  ;;  %v569_v13 = vpack.c.bf16 %v474_v9, %v473_v8  ;;  %v520_v15 = vld [vmem:[%s2476_s8 + $0x478] sm:$0xff] }
  0x7d   : > { %1977 = vmatprep.subr.bf16.mxu1 %v580_v27  ;;  %1924 = vmatpush3.bf16.msra.mxu0 %v557_v30  ;;  %v553_v16 = vpack.c.bf16 %v442_v12, %v441_v11  ;;  %v592_v17 = vpack.c.bf16 %v520_v15, %v519_v14  ;;  %v2158_v18 = vld [vmem:[%s2478_s9 + $0x120] ss:$36 sps:$4 sm:$0xff]   ;;  %v2164_v22 = vld [vmem:[%s2478_s9 + $0x168] ss:$36 sps:$4 sm:$0xff]   ;;  %v2168_v24 = vld [vmem:[%s2478_s9 + $0x14] ss:$36 sps:$4 sm:$0xff]  }
  0x7e   : > { %990 = vmatmul.mubr.bf16.gmra.mxu0 %v2146_v23  ;;  %1925 = vmatprep.subr.bf16.mxu0 %v564_v38  ;;  %v2165_v23 = vld [vmem:[%s2478_s9 + $0x170] ss:$36 sps:$4 sm:$0xff]   ;;  %v2169_v27 = vld [vmem:[%s2478_s9 + $0x18] ss:$36 sps:$4 sm:$0xff]   ;;  %v2177_v39 = vld [vmem:[%s2478_s9 + $0x60] ss:$36 sps:$4 sm:$0xff]  }
  0x7f   : > { %1071 = vmatmul.mubr.bf16.gmra.mxu1 %v2147_v25  ;;  %997 = vmatprep.mubr.bf16.mxu0 %v2148_v26  ;;  %v2171_v25 = vld [vmem:[%s2478_s9 + $0x1c] ss:$36 sps:$4 sm:$0xff]   ;;  %v2166_v26 = vld [vmem:[%s2478_s9 + $0x10] ss:$36 sps:$4 sm:$0xff]   ;;  %v2178_v40 = vld [vmem:[%s2478_s9 + $0xa4] ss:$36 sps:$4 sm:$0xff]  }
  0x80   : > { %1078 = vmatprep.mubr.bf16.mxu1 %v2150_v31  ;;  %1978 = vmatpush3.bf16.msra.mxu1 %v572_v37  ;;  %v517_v28 = vld [vmem:[%s2476_s8 + $0x460] sm:$0xff]  ;;  %v518_v29 = vld [vmem:[%s2476_s8 + $0x468] sm:$0xff]  ;;  %v515_v33 = vld [vmem:[%s2476_s8 + $0x450] sm:$0xff] }
  0x81   : > { %1979 = vmatprep.subr.bf16.mxu1 %v579_v42  ;;  %1926 = vmatpush3.bf16.msra.mxu0 %v556_v45  ;;  %v2172_v30 = vld [vmem:[%s2478_s9 + $0x5c] ss:$36 sps:$4 sm:$0xff]   ;;  %v2174_v31 = vld [vmem:[%s2478_s9 + $0x64] ss:$36 sps:$4 sm:$0xff]   ;;  %v591_v32 = vpack.c.bf16 %v518_v29, %v517_v28  ;;  %v2184_v50 = vld [vmem:[%s2478_s9 + $0xec] ss:$36 sps:$4 sm:$0xff]  }
  0x82   : > { %1927 = vmatprep.subr.bf16.mxu0 %v563_v47  ;;  %v516_v34 = vld [vmem:[%s2476_s8 + $0x458] sm:$0xff]  ;;  %v513_v37 = vld [vmem:[%s2476_s8 + $0x440] sm:$0xff]  ;;  %v514_v38 = vld [vmem:[%s2476_s8 + $0x448] sm:$0xff] }
  0x83   : > { %v590_v35 = vpack.c.bf16 %v516_v34, %v515_v33  ;;  %v589_v42 = vpack.c.bf16 %v514_v38, %v513_v37  ;;  %v511_v43 = vld [vmem:[%s2476_s8 + $0x430] sm:$0xff]  ;;  %v512_v44 = vld [vmem:[%s2476_s8 + $0x438] sm:$0xff]  ;;  %v509_v47 = vld [vmem:[%s2476_s8 + $0x420] sm:$0xff] }
  0x84   : > { %1980 = vmatpush3.bf16.msra.mxu1 %v571_v52  ;;  %v588_v45 = vpack.c.bf16 %v512_v44, %v511_v43  ;;  %v2182_v46 = vld [vmem:[%s2478_s9 + $0xa0] ss:$36 sps:$4 sm:$0xff]   ;;  %v510_v48 = vld [vmem:[%s2476_s8 + $0x428] sm:$0xff]  ;;  %v2189_v59 = vld [vmem:[%s2478_s9 + $0xf0] ss:$36 sps:$4 sm:$0xff]  }
  0x85   : > { %1981 = vmatprep.subr.bf16.mxu1 %v578_v54  ;;  %1928 = vmatpush3.bf16.msra.mxu0 %v555_v55  ;;  %v2183_v49 = vld [vmem:[%s2478_s9 + $0xa8] ss:$36 sps:$4 sm:$0xff]   ;;  %v587_v52 = vpack.c.bf16 %v510_v48, %v509_v47  ;;  %v505_v57 = vld [vmem:[%s2476_s8 + $0x400] sm:$0xff]  ;;  %v2195_v0 = vld [vmem:[%s2478_s9 + $0x138] ss:$36 sps:$4 sm:$0xff]  }
  0x86   : > { %998 = vmatmul.mubr.bf16.gmra.mxu0 %v2152_v51  ;;  %1929 = vmatprep.subr.bf16.mxu0 %v562_v63  ;;  %v2186_v51 = vld [vmem:[%s2478_s9 + $0xf4] ss:$36 sps:$4 sm:$0xff]   ;;  %v2188_v56 = vld [vmem:[%s2478_s9 + $0xe8] ss:$36 sps:$4 sm:$0xff]   ;;  %v2192_v61 = vld [vmem:[%s2478_s9 + $0x13c] ss:$36 sps:$4 sm:$0xff]  }
  0x87   : > { %1079 = vmatmul.mubr.bf16.gmra.mxu1 %v2153_v53  ;;  %1005 = vmatprep.mubr.bf16.mxu0 %v2154_v62  ;;  %v507_v53 = vld [vmem:[%s2476_s8 + $0x410] sm:$0xff]  ;;  %v508_v54 = vld [vmem:[%s2476_s8 + $0x418] sm:$0xff]  ;;  %v506_v58 = vld [vmem:[%s2476_s8 + $0x408] sm:$0xff] }
  0x88   : > { %1086 = vmatprep.mubr.bf16.mxu1 %v2156_v2  ;;  %1982 = vmatpush3.bf16.msra.mxu1 %v570_v3  ;;  %v586_v55 = vpack.c.bf16 %v508_v54, %v507_v53  ;;  %v2190_v60 = vld [vmem:[%s2478_s9 + $0x134] ss:$36 sps:$4 sm:$0xff]   ;;  %v585_v62 = vpack.c.bf16 %v506_v58, %v505_v57  ;;  %v2196_v1 = vld [vmem:[%s2478_s9 + $0x17c] ss:$36 sps:$4 sm:$0xff]   ;;  %v2198_v2 = vld [vmem:[%s2478_s9 + $0x184] ss:$36 sps:$4 sm:$0xff]  }
  0x89   : > { %1930 = vmatpush3.bf16.msra.mxu0 %v554_v6  ;;  %1983 = vmatprep.subr.bf16.mxu1 %v577_v7  ;;  %v2194_v63 = vld [vmem:[%s2478_s9 + $0x130] ss:$36 sps:$4 sm:$0xff]   ;;  %v2200_v3 = vld [vmem:[%s2478_s9 + $0x178] ss:$36 sps:$4 sm:$0xff]   ;;  %v2201_v4 = vld [vmem:[%s2478_s9 + $0x180] ss:$36 sps:$4 sm:$0xff]  }
  0x8a   : > { %1931 = vmatprep.subr.bf16.mxu0 %v561_v10  ;;  %v2202_v5 = vld [vmem:[%s2478_s9 + $0x20] ss:$36 sps:$4 sm:$0xff]   ;;  %v2203_v6 = vld [vmem:[%s2478_s9 + $0xb0] ss:$36 sps:$4 sm:$0xff]   ;;  %v2204_v7 = vld [vmem:[%s2478_s9 + $0x68] ss:$36 sps:$4 sm:$0xff]  }
  0x8b   : > { %v2205_v8 = vld [vmem:[%s2478_s9 + $0xf8] ss:$36 sps:$4 sm:$0xff]   ;;  %v2206_v9 = vld [vmem:[%s2478_s9 + $0x140] ss:$36 sps:$4 sm:$0xff]   ;;  %v2207_v10 = vld [vmem:[%s2478_s9 + $0x188] ss:$36 sps:$4 sm:$0xff]  }
  0x8c   : > { %1984 = vmatpush3.bf16.msra.mxu1 %v569_v13 }
  0x8d   : > { %1932 = vmatpush3.bf16.msra.mxu0 %v553_v16  ;;  %2063 = vmatprep.subr.bf16.mxu1 %v592_v17 }
  0x8e   : > { %1006 = vmatmul.mubr.bf16.gmra.mxu0 %v2158_v18  ;;  %2035 = vmatprep.subr.bf16.mxu0 %v592_v17 }
  0x8f   : > { %1087 = vmatmul.mubr.bf16.gmra.mxu1 %v2159_v19  ;;  %1013 = vmatprep.mubr.bf16.mxu0 %v2160_v20 }
  0x90   : > { %1094 = vmatprep.mubr.bf16.mxu1 %v2162_v21 }
  0x96   : > { %1014 = vmatmul.mubr.bf16.gmra.mxu0 %v2164_v22 }
  0x97   : > { %1095 = vmatmul.mubr.bf16.gmra.mxu1 %v2165_v23  ;;  %1135 = vmatprep.mubr.bf16.mxu0 %v2168_v24 }
  0x98   : > { %1216 = vmatprep.mubr.bf16.mxu1 %v2171_v25 }
  0x9e   : > { %1136 = vmatmul.mubr.bf16.vlgmr.msra.gmra.mxu0 %v2166_v26 }
  0x9f   : > { %1217 = vmatmul.mubr.bf16.vlgmr.msra.gmra.mxu1 %v2169_v27  ;;  %1143 = vmatprep.mubr.bf16.mxu0 %v2172_v30 }
  0xa0   : > { %2071 = vmatpush3.bf16.msra.mxu1 %v592_v17  ;;  %1224 = vmatprep.mubr.bf16.mxu1 %v2174_v31 }
  0xa1   : > { %2064 = vmatprep.subr.bf16.mxu1 %v591_v32  ;;  %2036 = vmatpush3.bf16.msra.mxu0 %v592_v17 }
  0xa2   : > { %2037 = vmatprep.subr.bf16.mxu0 %v591_v32 }
  0xa4   : > { %2072 = vmatpush3.bf16.msra.mxu1 %v591_v32 }
  0xa5   : > { %2065 = vmatprep.subr.bf16.mxu1 %v590_v35  ;;  %2038 = vmatpush3.bf16.msra.mxu0 %v591_v32 }
  0xa6   : > { %1144 = vmatmul.mubr.bf16.gmra.mxu0 %v2176_v36  ;;  %2039 = vmatprep.subr.bf16.mxu0 %v590_v35 }
  0xa7   : > { %1225 = vmatmul.mubr.bf16.gmra.mxu1 %v2177_v39  ;;  %1151 = vmatprep.mubr.bf16.mxu0 %v2178_v40 }
  0xa8   : > { %2073 = vmatpush3.bf16.msra.mxu1 %v590_v35  ;;  %1232 = vmatprep.mubr.bf16.mxu1 %v2180_v41 }
  0xa9   : > { %2066 = vmatprep.subr.bf16.mxu1 %v589_v42  ;;  %2040 = vmatpush3.bf16.msra.mxu0 %v590_v35 }
  0xaa   : > { %2041 = vmatprep.subr.bf16.mxu0 %v589_v42 }
  0xac   : > { %2074 = vmatpush3.bf16.msra.mxu1 %v589_v42 }
  0xad   : > { %2067 = vmatprep.subr.bf16.mxu1 %v588_v45  ;;  %2042 = vmatpush3.bf16.msra.mxu0 %v589_v42 }
  0xae   : > { %1152 = vmatmul.mubr.bf16.gmra.mxu0 %v2182_v46  ;;  %2043 = vmatprep.subr.bf16.mxu0 %v588_v45 }
  0xaf   : > { %1233 = vmatmul.mubr.bf16.gmra.mxu1 %v2183_v49  ;;  %1159 = vmatprep.mubr.bf16.mxu0 %v2184_v50 }
  0xb0   : > { %1240 = vmatprep.mubr.bf16.mxu1 %v2186_v51  ;;  %2075 = vmatpush3.bf16.msra.mxu1 %v588_v45 }
  0xb1   : > { %2068 = vmatprep.subr.bf16.mxu1 %v587_v52  ;;  %2044 = vmatpush3.bf16.msra.mxu0 %v588_v45 }
  0xb2   : > { %2045 = vmatprep.subr.bf16.mxu0 %v587_v52 }
  0xb4   : > { %2076 = vmatpush3.bf16.msra.mxu1 %v587_v52 }
  0xb5   : > { %2069 = vmatprep.subr.bf16.mxu1 %v586_v55  ;;  %2046 = vmatpush3.bf16.msra.mxu0 %v587_v52 }
  0xb6   : > { %1160 = vmatmul.mubr.bf16.gmra.mxu0 %v2188_v56  ;;  %2047 = vmatprep.subr.bf16.mxu0 %v586_v55 }
  0xb7   : > { %1241 = vmatmul.mubr.bf16.gmra.mxu1 %v2189_v59  ;;  %1167 = vmatprep.mubr.bf16.mxu0 %v2190_v60 }
  0xb8   : > { %1248 = vmatprep.mubr.bf16.mxu1 %v2192_v61  ;;  %2077 = vmatpush3.bf16.msra.mxu1 %v586_v55 }
  0xb9   : > { %2048 = vmatpush3.bf16.msra.mxu0 %v586_v55  ;;  %2070 = vmatprep.subr.bf16.mxu1 %v585_v62 }
  0xba   : > { %2049 = vmatprep.subr.bf16.mxu0 %v585_v62 }
  0xbc   : > { %2078 = vmatpush3.bf16.msra.mxu1 %v585_v62 }
  0xbd   : > { %2050 = vmatpush3.bf16.msra.mxu0 %v585_v62 }
  0xbe   : > { %1168 = vmatmul.mubr.bf16.gmra.mxu0 %v2194_v63 }
  0xbf   : > { %1249 = vmatmul.mubr.bf16.gmra.mxu1 %v2195_v0  ;;  %1175 = vmatprep.mubr.bf16.mxu0 %v2196_v1 }
  0xc0   : > { %1256 = vmatprep.mubr.bf16.mxu1 %v2198_v2 }
  0xc6   : > { %1176 = vmatmul.mubr.bf16.gmra.mxu0 %v2200_v3 }
  0xc7   : > { %1257 = vmatmul.mubr.bf16.gmra.mxu1 %v2201_v4  ;;  %2051 = vmatprep.mubr.bf16.mxu0 %v2202_v5 }
  0xc8   : > { %2055 = vmatprep.mubr.bf16.mxu1 %v2203_v6 }
  0xce   : > { %2052 = vmatmul.mubr.bf16.vlgmr.msra.gmra.mxu0 %v2204_v7 }
  0xcf   : > { %2056 = vmatmul.mubr.bf16.vlgmr.msra.gmra.mxu1 %v2205_v8 }
  0xd0   : > { %2059 = vmatprep.mubr.bf16.mxu1 %v2206_v9 }
  0xd7   : > { %2060 = vmatmul.mubr.bf16.gmra.mxu1 %v2207_v10 }
 0x12e   : > { %v1829_v11 = vpop.f32.mrf.mxu0 }
 0x12f   : > { %v1881_v12 = vpop.f32.mrf.mxu1 }
 0x130   : > { %v1830_v13 = vpop.f32.mrf.mxu0 }
 0x131   : > { %v1831_v14 = vadd.f32 %v1830_v13, %v1829_v11  ;;  %v1882_v15 = vpop.f32.mrf.mxu1 }
 0x132   : > { %v1883_v16 = vadd.f32 %v1882_v15, %v1881_v12  ;;  %v1832_v17 = vpop.f32.mrf.mxu0 }
 0x133   : > { %v1884_v18 = vpop.f32.mrf.mxu1 }
 0x134   : > { %v2679_v19 = vadd.f32 %v1883_v16, %v1831_v14  ;;  %v1833_v20 = vpop.f32.mrf.mxu0 }
 0x135   : > { %v1834_v21 = vadd.f32 %v1833_v20, %v1832_v17  ;;  %v1885_v22 = vpop.f32.mrf.mxu1 }
 0x136   : > { %v1886_v23 = vadd.f32 %v1885_v22, %v1884_v18  ;;  %v1835_v24 = vpop.f32.mrf.mxu0 }
 0x137   : > { %v1887_v25 = vpop.f32.mrf.mxu1 }
 0x138   : > { %v2681_v26 = vadd.f32 %v1886_v23, %v1834_v21  ;;  %v1836_v27 = vpop.f32.mrf.mxu0 }
 0x139   : > { %v1837_v28 = vadd.f32 %v1836_v27, %v1835_v24  ;;  %v1888_v29 = vpop.f32.mrf.mxu1 }
 0x13a   : > { %v1889_v30 = vadd.f32 %v1888_v29, %v1887_v25  ;;  %v1838_v31 = vpop.f32.mrf.mxu0 }
 0x13b   : > { %v1890_v32 = vpop.f32.mrf.mxu1 }
 0x13c   : > { %v2683_v33 = vadd.f32 %v1889_v30, %v1837_v28  ;;  %v1839_v34 = vpop.f32.mrf.mxu0 }
 0x13d   : > { %v1840_v35 = vadd.f32 %v1839_v34, %v1838_v31  ;;  %v1891_v36 = vpop.f32.mrf.mxu1 }
 0x13e   : > { %v1892_v37 = vadd.f32 %v1891_v36, %v1890_v32  ;;  %v1841_v38 = vpop.f32.mrf.mxu0 }
 0x13f   : > { %v1893_v39 = vpop.f32.mrf.mxu1 }
 0x140   : > { %v2685_v40 = vadd.f32 %v1892_v37, %v1840_v35  ;;  %v1842_v41 = vpop.f32.mrf.mxu0 }
 0x141   : > { %v1843_v42 = vadd.f32 %v1842_v41, %v1841_v38  ;;  %v1894_v43 = vpop.f32.mrf.mxu1 }
 0x142   : > { %v1895_v44 = vadd.f32 %v1894_v43, %v1893_v39  ;;  %v1844_v45 = vpop.f32.mrf.mxu0 }
 0x143   : > { %v1896_v46 = vpop.f32.mrf.mxu1 }
 0x144   : > { %v2687_v47 = vadd.f32 %v1895_v44, %v1843_v42  ;;  %v1845_v48 = vpop.f32.mrf.mxu0 }
 0x145   : > { %v1846_v49 = vadd.f32 %v1845_v48, %v1844_v45  ;;  %v1897_v50 = vpop.f32.mrf.mxu1 }
 0x146   : > { %v1898_v51 = vadd.f32 %v1897_v50, %v1896_v46  ;;  %v1847_v52 = vpop.f32.mrf.mxu0 }
 0x147   : > { %v1899_v53 = vpop.f32.mrf.mxu1 }
 0x148   : > { %v2689_v54 = vadd.f32 %v1898_v51, %v1846_v49  ;;  %v1848_v55 = vpop.f32.mrf.mxu0 }
 0x149   : > { %v1849_v56 = vadd.f32 %v1848_v55, %v1847_v52  ;;  %v1900_v57 = vpop.f32.mrf.mxu1 }
 0x14a   : > { %v1901_v58 = vadd.f32 %v1900_v57, %v1899_v53  ;;  %v1850_v59 = vpop.f32.mrf.mxu0 }
 0x14b   : > { %v1902_v60 = vpop.f32.mrf.mxu1 }
 0x14c   : > { %v2691_v61 = vadd.f32 %v1901_v58, %v1849_v56  ;;  %v1851_v62 = vpop.f32.mrf.mxu0 }
 0x14d   : > { %v1852_v63 = vadd.f32 %v1851_v62, %v1850_v59  ;;  %v1903_v0 = vpop.f32.mrf.mxu1 }
 0x14e   : > { %v1904_v1 = vadd.f32 %v1903_v0, %v1902_v60  ;;  %v1853_v2 = vpop.f32.mrf.mxu0 }
 0x14f   : > { %v1905_v3 = vpop.f32.mrf.mxu1 }
 0x150   : > { %v2693_v4 = vadd.f32 %v1904_v1, %v1852_v63  ;;  %v1854_v5 = vpop.f32.mrf.mxu0 }
 0x151   : > { %v1855_v6 = vadd.f32 %v1854_v5, %v1853_v2  ;;  %v1906_v7 = vpop.f32.mrf.mxu1 }
 0x152   : > { %v1907_v8 = vadd.f32 %v1906_v7, %v1905_v3  ;;  %v1856_v9 = vpop.f32.mrf.mxu0 }
 0x153   : > { %v1908_v10 = vpop.f32.mrf.mxu1 }
 0x154   : > { %v2695_v11 = vadd.f32 %v1907_v8, %v1855_v6  ;;  %v1857_v12 = vpop.f32.mrf.mxu0 }
 0x155   : > { %v1858_v13 = vadd.f32 %v1857_v12, %v1856_v9  ;;  %v1909_v14 = vpop.f32.mrf.mxu1 }
 0x156   : > { %2832 = vst [vmem:[#allocation7_spill] sm:$0xff] %v2695_v11  ;;  %v1910_v15 = vadd.f32 %v1909_v14, %v1908_v10  ;;  %v1859_v16 = vpop.f32.mrf.mxu0 }
 0x157   : > { %v1911_v17 = vpop.f32.mrf.mxu1 }
 0x158   : > { %v2697_v18 = vadd.f32 %v1910_v15, %v1858_v13  ;;  %v1860_v20 = vpop.f32.mrf.mxu0 }
 0x159   : > { %v1912_v21 = vpop.f32.mrf.mxu1  ;;  %v1861_v12 = vadd.f32 %v1860_v20, %v1859_v16 }
 0x15a   : > { %2833 = vst [vmem:[#allocation8_spill] sm:$0xff] %v2697_v18  ;;  %v1862_v22 = vpop.f32.mrf.mxu0  ;;  %v1913_v13 = vadd.f32 %v1912_v21, %v1911_v17 }
 0x15b   : > { %v1914_v23 = vpop.f32.mrf.mxu1 }
 0x15c   : > { %v1863_v24 = vpop.f32.mrf.mxu0 }
 0x15d   : > { %v1915_v25 = vpop.f32.mrf.mxu1  ;;  %v1864_v18 = vadd.f32 %v1863_v24, %v1862_v22 }
 0x15e   : > { %v1933_v27 = vpop.f32.mrf.mxu0  ;;  %v1916_v11 = vadd.f32 %v1915_v25, %v1914_v23 }
 0x15f   : > { %v1985_v28 = vpop.f32.mrf.mxu1 }
 0x160   : > { %v1934_v29 = vpop.f32.mrf.mxu0  ;;  %v2726_v20 = vadd.f32 %v1916_v11, %v1864_v18 }
 0x161   : > { %v1986_v30 = vpop.f32.mrf.mxu1  ;;  %v1935_v8 = vadd.f32 %v1934_v29, %v1933_v27 }
 0x162   : > { %v1936_v31 = vpop.f32.mrf.mxu0  ;;  %v1987_v21 = vadd.f32 %v1986_v30, %v1985_v28 }
 0x163   : > { %v2699_v32 = vpop.f32.mrf.mxu1 }
 0x164   : > { %v1937_v34 = vpop.f32.mrf.mxu0 }
 0x165   : > { %v2701_v35 = vpop.f32.mrf.mxu1 }
 0x166   : > { %v1939_v36 = vpop.f32.mrf.mxu0 }
 0x167   : > { %v1991_v37 = vpop.f32.mrf.mxu1 }
 0x168   : > { %v1940_v38 = vpop.f32.mrf.mxu0 }
 0x169   : > { %v1992_v39 = vpop.f32.mrf.mxu1  ;;  %v1941_v9 = vadd.f32 %v1940_v38, %v1939_v36  ;;  %v1097_v36 = vadd.f32 %v1913_v13, %v1861_v12 }
 0x16a   : > { %v1942_v41 = vpop.f32.mrf.mxu0  ;;  %v1993_v22 = vadd.f32 %v1992_v39, %v1991_v37 }
 0x16b   : > { %v2703_v42 = vpop.f32.mrf.mxu1 }
 0x16c   : > { %v1943_v43 = vpop.f32.mrf.mxu0 }
 0x16d   : > { %v1995_v44 = vpop.f32.mrf.mxu1 }
 0x16e   : > { %v1945_v45 = vpop.f32.mrf.mxu0  ;;  %v1996_v30 = vadd.f32 %v1995_v44, %v2703_v42 }
 0x16f   : > { %v1997_v46 = vpop.f32.mrf.mxu1 }
 0x170   : > { %v1946_v48 = vpop.f32.mrf.mxu0 }
 0x171   : > { %v1998_v49 = vpop.f32.mrf.mxu1 }
 0x172   : > { %v1948_v50 = vpop.f32.mrf.mxu0  ;;  %v1999_v37 = vadd.f32 %v1998_v49, %v1997_v46 }
 0x173   : > { %v2705_v51 = vpop.f32.mrf.mxu1 }
 0x174   : > { %2834 = vst [vmem:[#allocation9_spill] sm:$0xff] %v2705_v51  ;;  %v1949_v52 = vpop.f32.mrf.mxu0  ;;  %v1947_v51 = vadd.f32 %v1946_v48, %v1945_v45 }
 0x175   : > { %v2707_v53 = vpop.f32.mrf.mxu1  ;;  %v1950_v23 = vadd.f32 %v1949_v52, %v1948_v50  ;;  %v599_v50 = vld [vmem:[#allocation2 + $0x30] sm:$0xff] }
 0x176   : > { %2835 = vst [vmem:[#allocation10_spill] sm:$0xff] %v2707_v53  ;;  %v1951_v55 = vpop.f32.mrf.mxu0  ;;  %v1938_v53 = vadd.f32 %v1937_v34, %v1936_v31 }
 0x177   : > { %v2003_v56 = vpop.f32.mrf.mxu1 }
 0x178   : > { %v1952_v57 = vpop.f32.mrf.mxu0  ;;  %v1141_v25 = vadd.f32 %v1938_v53, %v2681_v26  ;;  %v595_v26 = vld [vmem:[#allocation2 + $0x10] sm:$0xff] }
 0x179   : > { %v2004_v58 = vpop.f32.mrf.mxu1  ;;  %v1953_v14 = vadd.f32 %v1952_v57, %v1951_v55  ;;  %v597_v57 = vld [vmem:[#allocation2 + $0x20] sm:$0xff] }
 0x17a   : > { %v1954_v59 = vpop.f32.mrf.mxu0  ;;  %v2005_v31 = vadd.f32 %v2004_v58, %v2003_v56 }
 0x17b   : > { %v2006_v60 = vpop.f32.mrf.mxu1  ;;  %v1162_v16 = vadd.f32 %v1953_v14, %v2691_v61  ;;  %v1990_v61 = vadd.f32 %v2701_v35, %v2699_v32  ;;  %v2841_v56 = vld [vmem:[#allocation9_spill] sm:$0xff] }
 0x17c   : > { %v1955_v62 = vpop.f32.mrf.mxu0 }
 0x17d   : > { %v2007_v63 = vpop.f32.mrf.mxu1  ;;  %v1956_v27 = vadd.f32 %v1955_v62, %v1954_v59  ;;  %v1222_v55 = vadd.f32 %v1990_v61, %v1141_v25  ;;  %v2842_v42 = vld [vmem:[#allocation10_spill] sm:$0xff] }
 0x17e   : > { %v1957_v0 = vpop.f32.mrf.mxu0  ;;  %v2002_v44 = vadd.f32 %v2842_v42, %v2841_v56 }
 0x17f   : > { %v2709_v1 = vpop.f32.mrf.mxu1  ;;  %v1165_v38 = vadd.f32 %v1956_v27, %v2693_v4  ;;  %v593_v4 = vld [vmem:[#allocation2] sm:$0xff] }
 0x180   : > { %2836 = vst [vmem:[#allocation11_spill] sm:$0xff] %v2709_v1  ;;  %v1958_v2 = vpop.f32.mrf.mxu0 }
 0x181   : > { %v2711_v3 = vpop.f32.mrf.mxu1  ;;  %v1959_v45 = vadd.f32 %v1958_v2, %v1957_v0  ;;  %v596_v0 = vld [vmem:[#allocation2 + $0x18] sm:$0xff] }
 0x182   : > { %2837 = vst [vmem:[#allocation12_spill] sm:$0xff] %v2711_v3  ;;  %v2713_v5 = vpop.f32.mrf.mxu0  ;;  %v1944_v3 = vadd.f32 %v1943_v43, %v1942_v41  ;;  %v2008_v43 = vadd.f32 %v2007_v63, %v2006_v60 }
 0x183   : > { %2838 = vst [vmem:[#allocation13_spill] sm:$0xff] %v2713_v5  ;;  %v2715_v6 = vpop.f32.mrf.mxu1 }
 0x184   : > { %2839 = vst [vmem:[#allocation14_spill] sm:$0xff] %v2715_v6  ;;  %v2717_v7 = vpop.f32.mrf.mxu0  ;;  %v1138_v6 = vadd.f32 %v1935_v8, %v2679_v19  ;;  %v1149_v19 = vadd.f32 %v1944_v3, %v2685_v40  ;;  %v1243_v40 = vadd.f32 %v2005_v31, %v1162_v16  ;;  %v1246_v59 = vadd.f32 %v2008_v43, %v1165_v38  ;;  %v2843_v3 = vld [vmem:[#allocation7_spill] sm:$0xff]  ;;  %v600_v8 = vld [vmem:[#allocation2 + $0x38] sm:$0xff] }
 0x185   : > { %2840 = vst [vmem:[#allocation15_spill] sm:$0xff] %v2717_v7  ;;  %v2719_v10 = vpop.f32.mrf.mxu1  ;;  %v1146_v7 = vadd.f32 %v1941_v9, %v2683_v33  ;;  %v1154_v33 = vadd.f32 %v1947_v51, %v2687_v47  ;;  %v1157_v47 = vadd.f32 %v1950_v23, %v2689_v54  ;;  %v598_v31 = vld [vmem:[#allocation2 + $0x28] sm:$0xff] }
 0x186   : > { %v1963_v15 = vpop.f32.mrf.mxu0  ;;  %v1219_v28 = vadd.f32 %v1987_v21, %v1138_v6  ;;  %v1230_v53 = vadd.f32 %v1996_v30, %v1149_v19 }
 0x187   : > { %v2721_v1 = vpop.f32.mrf.mxu1  ;;  %v1227_v18 = vadd.f32 %v1993_v22, %v1146_v7  ;;  %v1235_v52 = vadd.f32 %v1999_v37, %v1154_v33  ;;  %v1238_v12 = vadd.f32 %v2002_v44, %v1157_v47  ;;  %v2846_v22 = vld [vmem:[#allocation11_spill] sm:$0xff] }
 0x188   : > { %v1964_v5 = vpop.f32.mrf.mxu0  ;;  %v601_v47 = vld [vmem:[#allocation2 + $0x40] sm:$0xff] }
 0x189   : > { %v2016_v29 = vpop.f32.mrf.mxu1  ;;  %v1965_v39 = vadd.f32 %v1964_v5, %v1963_v15  ;;  %v1170_v5 = vadd.f32 %v1959_v45, %v2843_v3  ;;  %v2847_v23 = vld [vmem:[#allocation12_spill] sm:$0xff] }
 0x18a   : > { %v1966_v17 = vpop.f32.mrf.mxu0  ;;  %v2844_v13 = vld [vmem:[#allocation13_spill] sm:$0xff]  ;;  %v2017_v27 = vadd.f32 %v2016_v29, %v2721_v1  ;;  %v2011_v25 = vadd.f32 %v2847_v23, %v2846_v22 }
 0x18b   : > { %v2728_v24 = vpop.f32.mrf.mxu1  ;;  %v1178_v54 = vadd.f32 %v1965_v39, %v1097_v36  ;;  %v2848_v39 = vld [vmem:[#allocation8_spill] sm:$0xff]  ;;  %v2849_v45 = vld [vmem:[#allocation14_spill] sm:$0xff] }
 0x18c   : > { %v1967_v34 = vpop.f32.mrf.mxu0  ;;  %v2845_v14 = vld [vmem:[#allocation15_spill] sm:$0xff]  ;;  %v1251_v37 = vadd.f32 %v2011_v25, %v1170_v5 }
 0x18d   : > { %v2736_v11 = vpop.f32.mrf.mxu1  ;;  %v1968_v60 = vadd.f32 %v1967_v34, %v1966_v17  ;;  %v1962_v15 = vadd.f32 %v2845_v14, %v2844_v13  ;;  %v594_v17 = vld [vmem:[#allocation2 + $0x8] sm:$0xff]  ;;  %v1259_v38 = vadd.f32 %v2017_v27, %v1178_v54 }
 0x18e   : > { %v2053_v41 = vpop.f32.mrf.mxu0 }
 0x18f   : > { %v1308_v48 = vadd.f32 %v2053_v41, %v1227_v18  ;;  %v2057_v32 = vpop.f32.mrf.mxu1  ;;  %v1181_v61 = vadd.f32 %v1968_v60, %v2726_v20  ;;  %v2020_v41 = vadd.f32 %v2736_v11, %v2728_v24 }
 0x190   : > { %v1324_v35 = vadd.f32 %v2057_v32, %v1243_v40  ;;  %v1299_v51 = vpop.f32.mrf.mxu0 }
 0x191   : > { %v1348_v46 = vadd.f32 %v1308_v48, %v595_v26  ;;  %v1300_v49 = vadd.f32 %v1299_v51, %v1219_v28  ;;  %v1315_v58 = vpop.f32.mrf.mxu1  ;;  %v603_v28 = vld [vmem:[#allocation2 + $0x50] sm:$0xff]  ;;  %v1173_v26 = vadd.f32 %v1962_v15, %v2848_v39  ;;  %v2014_v48 = vadd.f32 %v2719_v10, %v2849_v45 }
 0x192   : > { %v1352_v62 = vadd.f32 %v1324_v35, %v599_v50  ;;  %v1316_v63 = vadd.f32 %v1315_v58, %v1235_v52  ;;  %v2054_v2 = vpop.f32.mrf.mxu0  ;;  %v1262_v35 = vadd.f32 %v2020_v41, %v1181_v61 }
 0x193   : > { %1361 = vst.msk [vmem:[#allocation2 + $0x10] sm:$0xff] %vm1358_vm1, %v1348_v46  ;;  %v1346_v6 = vadd.f32 %v1300_v49, %v593_v4  ;;  %v1311_v7 = vadd.f32 %v2054_v2, %v1230_v53  ;;  %v2058_v9 = vpop.f32.mrf.mxu1  ;;  %v604_v4 = vld [vmem:[#allocation2 + $0x58] sm:$0xff]  ;;  %v1254_v52 = vadd.f32 %v2014_v48, %v1173_v26  ;;  %v602_v53 = vld [vmem:[#allocation2 + $0x48] sm:$0xff] }
 0x194   : > { %1365 = vst.msk [vmem:[#allocation2 + $0x30] sm:$0xff] %vm1358_vm1, %v1352_v62  ;;  %v1350_v36 = vadd.f32 %v1316_v63, %v597_v57  ;;  %v1327_v16 = vadd.f32 %v2058_v9, %v1246_v59  ;;  %v1302_v21 = vpop.f32.mrf.mxu0 }
 0x195   : > { %1359 = vst.msk [vmem:[#allocation2] sm:$0xff] %vm1358_vm1, %v1346_v6  ;;  %v1349_v19 = vadd.f32 %v1311_v7, %v596_v0  ;;  %v1303_v33 = vadd.f32 %v1302_v21, %v1222_v55  ;;  %v1318_v34 = vpop.f32.mrf.mxu1 }
 0x196   : > { %1363 = vst.msk [vmem:[#allocation2 + $0x20] sm:$0xff] %vm1358_vm1, %v1350_v36  ;;  %v1353_v1 = vadd.f32 %v1327_v16, %v600_v8  ;;  %v1319_v29 = vadd.f32 %v1318_v34, %v1238_v12 }
 0x197   : > { %1362 = vst.msk [vmem:[#allocation2 + $0x18] sm:$0xff] %vm1358_vm1, %v1349_v19  ;;  %v1347_v18 = vadd.f32 %v1303_v33, %v594_v17  ;;  %v2061_v30 = vpop.f32.mrf.mxu1 }
 0x198   : > { %1366 = vst.msk [vmem:[#allocation2 + $0x38] sm:$0xff] %vm1358_vm1, %v1353_v1  ;;  %v1351_v40 = vadd.f32 %v1319_v29, %v598_v31  ;;  %v1340_v20 = vadd.f32 %v2061_v30, %v1259_v38 }
 0x199   : > { %1360 = vst.msk [vmem:[#allocation2 + $0x8] sm:$0xff] %vm1358_vm1, %v1347_v18  ;;  %v1331_v43 = vpop.f32.mrf.mxu1 }
 0x19a   : > { %1364 = vst.msk [vmem:[#allocation2 + $0x28] sm:$0xff] %vm1358_vm1, %v1351_v40  ;;  %v1356_v50 = vadd.f32 %v1340_v20, %v603_v28  ;;  %v1332_v32 = vadd.f32 %v1331_v43, %v1251_v37 }
 0x19b   : > { %v2062_v51 = vpop.f32.mrf.mxu1 }
 0x19c   : > { %1369 = vst.msk [vmem:[#allocation2 + $0x50] sm:$0xff] %vm1358_vm1, %v1356_v50  ;;  %v1354_v24 = vadd.f32 %v1332_v32, %v601_v47  ;;  %v1343_v11 = vadd.f32 %v2062_v51, %v1262_v35 }
 0x19d   : > { %v1334_v55 = vpop.f32.mrf.mxu1 }
 0x19e   : > { %1367 = vst.msk [vmem:[#allocation2 + $0x40] sm:$0xff] %vm1358_vm1, %v1354_v24  ;;  %v1357_v56 = vadd.f32 %v1343_v11, %v604_v4  ;;  %v1335_v42 = vadd.f32 %v1334_v55, %v1254_v52  ;;  %1374 = sbr.rel (%p1806_p11) target bundleno = 737 (0x2e1), region = 66 }
 0x1a0   : > { %1370 = vst.msk [vmem:[#allocation2 + $0x58] sm:$0xff] %vm1358_vm1, %v1357_v56  ;;  %v1355_v10 = vadd.f32 %v1335_v42, %v602_v53 }
 0x1a2   : > { %1368 = vst.msk [vmem:[#allocation2 + $0x48] sm:$0xff] %vm1358_vm1, %v1355_v10 }
 0x1a3   : > { %v1377_v44 = vld [vmem:[#allocation2 + $0x10] sm:$0xff]  ;;  %v1375_v46 = vld [vmem:[#allocation2] sm:$0xff]  ;;  %v1378_v49 = vld [vmem:[#allocation2 + $0x18] sm:$0xff]  ;;  %v2279_v17 = vmov 0   ;;  %v1548_v42 = vlaneseq  ;;  %vm1559_vm2 = vcmask 130112   ;;  %vm1566_vm3 = vcmask 195712  }
 0x1a4   : > { %v1393_v57 = vsel %vm1358_vm1, %v1377_v44, 0.0  ;;  %v1387_v58 = vsel %vm1358_vm1, %v1375_v46, 0.0  ;;  %v1376_v59 = vld [vmem:[#allocation2 + $0x8] sm:$0xff]  ;;  %v1396_v54 = vsel %vm1358_vm1, %v1378_v49, 0.0  ;;  %v1379_v63 = vld [vmem:[#allocation2 + $0x20] sm:$0xff]  ;;  %v1382_v3 = vld [vmem:[#allocation2 + $0x38] sm:$0xff]  ;;  %2209 = vset.pattern.permute.xlu1 %v2279_v17  ;;  %2208 = vset.pattern.permute.xlu0 %v2279_v17 }
 0x1a5   : > { %1394 = vadd.xlane.f32.xlu1 %v1393_v57  ;;  %1388 = vadd.xlane.f32.xlu0 %v1387_v58  ;;  %v1390_v60 = vsel %vm1358_vm1, %v1376_v59, 0.0  ;;  %v1380_v62 = vld [vmem:[#allocation2 + $0x28] sm:$0xff]  ;;  %v1399_v2 = vsel %vm1358_vm1, %v1379_v63, 0.0  ;;  %v1381_v5 = vld [vmem:[#allocation2 + $0x30] sm:$0xff]  ;;  %v1408_v6 = vsel %vm1358_vm1, %v1382_v3, 0.0  ;;  %v1383_v9 = vld [vmem:[#allocation2 + $0x40] sm:$0xff] }
 0x1a6   : > { %v1402_v0 = vsel %vm1358_vm1, %v1380_v62, 0.0  ;;  %v1405_v7 = vsel %vm1358_vm1, %v1381_v5, 0.0  ;;  %v1411_v13 = vsel %vm1358_vm1, %v1383_v9, 0.0  ;;  %v1385_v15 = vld [vmem:[#allocation2 + $0x50] sm:$0xff]  ;;  %v1807_v16 = vld [vmem:[%s2830_s2] ss:$0 sm:$0xff] }
 0x1a7   : > { %v1386_v14 = vld [vmem:[#allocation2 + $0x58] sm:$0xff]  ;;  %v1417_v36 = vsel %vm1358_vm1, %v1385_v15, 0.0  ;;  %v1549_v10 = vand.u32 127, %v1548_v42  ;;  %v2782_v44 = vshrl.u32 %v1548_v42, 7  ;;  %vm1573_vm4 = vcmask 261312  }
 0x1a8   : > { %v1420_v27 = vsel %vm1358_vm1, %v1386_v14, 0.0  ;;  %vm1580_vm5 = vcmask 326912   ;;  %vm1587_vm6 = vcmask 392512   ;;  %vm1594_vm7 = vcmask 458112  }
 0x1a9   : > { %1397 = vadd.xlane.f32.xlu1 %v1396_v54  ;;  %1391 = vadd.xlane.f32.xlu0 %v1390_v60  ;;  %v1384_v8 = vld [vmem:[#allocation2 + $0x48] sm:$0xff]  ;;  %v1554_v46 = vadd.s32 4294967288, %v1549_v10  ;;  %v1561_v49 = vadd.s32 4294967280, %v1549_v10  ;;  %v1552_v59 = vsub.s32 %v1549_v10, %v2782_v44  ;;  %v1568_v54 = vadd.s32 4294967272, %v1549_v10 }
 0x1aa   : > { %v1414_v12 = vsel %vm1358_vm1, %v1384_v8, 0.0  ;;  %v1575_v63 = vadd.s32 4294967264, %v1549_v10  ;;  %v1589_v9 = vadd.s32 4294967248, %v1549_v10  ;;  %vm1601_vm8 = vcmask 523712  }
 0x1ab   : > { %v1557_v58 = vsub.s32 %v1554_v46, %v2782_v44  ;;  %v1564_v62 = vsub.s32 %v1561_v49, %v2782_v44  ;;  %v1571_v5 = vsub.s32 %v1568_v54, %v2782_v44  ;;  %vm1608_vm9 = vcmask 589312  }
 0x1ac   : > { %v1578_v8 = vsub.s32 %v1575_v63, %v2782_v44  ;;  %vm1615_vm10 = vcmask 654912   ;;  %vm1622_vm11 = vcmask 720512   ;;  %vm1629_vm12 = vcmask 786112  }
 0x1ad   : > { %1403 = vadd.xlane.f32.xlu1 %v1402_v0  ;;  %1400 = vadd.xlane.f32.xlu0 %v1399_v2  ;;  %vm1632_vm13 = vcmask 778240  }
 0x1b1   : > { %1409 = vadd.xlane.f32.xlu1 %v1408_v6  ;;  %1406 = vadd.xlane.f32.xlu0 %v1405_v7  ;;  %v1582_v6 = vadd.s32 4294967256, %v1549_v10 }
 0x1b5   : > { %1415 = vadd.xlane.f32.xlu1 %v1414_v12  ;;  %1412 = vadd.xlane.f32.xlu0 %v1411_v13 }
 0x1b9   : > { %1421 = vadd.xlane.f32.xlu1 %v1420_v27  ;;  %1418 = vadd.xlane.f32.xlu0 %v1417_v36  ;;  %v1585_v27 = vsub.s32 %v1582_v6, %v2782_v44  ;;  %v1596_v36 = vadd.s32 4294967240, %v1549_v10 }
 0x1ca   : > { %1434 = vbcast.lane.b32.xlu1 %v1807_v16, 264 }
 0x1ce   : > { %1438 = vbcast.lane.b32.xlu1 %v1807_v16, 272 }
 0x1cf   : > { %1430 = vbcast.lane.b32.xlu0 %v1807_v16, 256 }
 0x1d2   : > { %1442 = vbcast.lane.b32.xlu1 %v1807_v16, 280 }
 0x1d3   : > { %1446 = vbcast.lane.b32.xlu0 %v1807_v16, 288 }
 0x1d6   : > { %1450 = vbcast.lane.b32.xlu1 %v1807_v16, 296 }
 0x1d7   : > { %1454 = vbcast.lane.b32.xlu0 %v1807_v16, 304 }
 0x1da   : > { %1458 = vbcast.lane.b32.xlu1 %v1807_v16, 312 }
 0x1db   : > { %1462 = vbcast.lane.b32.xlu0 %v1807_v16, 320 }
 0x1de   : > { %1466 = vbcast.lane.b32.xlu1 %v1807_v16, 328 }
 0x1df   : > { %1470 = vbcast.lane.b32.xlu0 %v1807_v16, 336 }
 0x1e2   : > { %1474 = vbcast.lane.b32.xlu1 %v1807_v16, 344 }
 0x22e   : > { %v1395_v21 = vpop.xlane.xlu1 %1394  ;;  %v1389_v22 = vpop.xlane.xlu0 %1388 }
 0x232   : > { %v1398_v23 = vpop.xlane.xlu1 %1397  ;;  %v1392_v25 = vpop.xlane.xlu0 %1391 }
 0x236   : > { %v1404_v19 = vpop.xlane.xlu1 %1403  ;;  %v1401_v33 = vpop.xlane.xlu0 %1400 }
 0x23a   : > { %v1410_v31 = vpop.xlane.xlu1 %1409  ;;  %v1407_v34 = vpop.xlane.xlu0 %1406 }
 0x23e   : > { %v1416_v61 = vpop.xlane.xlu1 %1415  ;;  %v1413_v1 = vpop.xlane.xlu0 %1412 }
 0x242   : > { %v1422_v29 = vpop.xlane.xlu1 %1421  ;;  %v1419_v38 = vpop.xlane.xlu0 %1418 }
 0x246   : > { %v1435_v18 = vpop.permute.xlu1 %1434  ;;  %v1431_v28 = vpop.permute.xlu0 %1430 }
 0x247   : > { %v1489_v30 = vadd.f32 %v1435_v18, %v1392_v25  ;;  %v1488_v37 = vadd.f32 %v1431_v28, %v1389_v22  ;;  %v1603_v22 = vadd.s32 4294967232, %v1549_v10 }
 0x249   : > { %1516 = vperm.xlu1 %2209, %v1489_v30   ;;  %1513 = vperm.xlu0 %2208, %v1488_v37  }
 0x24a   : > { %v1439_v39 = vpop.permute.xlu1 %1438  ;;  %v1447_v26 = vpop.permute.xlu0 %1446 }
 0x24b   : > { %v1490_v41 = vadd.f32 %v1439_v39, %v1395_v21  ;;  %v1492_v47 = vadd.f32 %v1447_v26, %v1401_v33  ;;  %v1592_v21 = vsub.s32 %v1589_v9, %v2782_v44  ;;  %v1624_v26 = vadd.s32 4294967208, %v1549_v10 }
 0x24d   : > { %1519 = vperm.xlu1 %2209, %v1490_v41  }
 0x24e   : > { %v1443_v40 = vpop.permute.xlu1 %1442  ;;  %v1455_v20 = vpop.permute.xlu0 %1454 }
 0x24f   : > { %v1491_v43 = vadd.f32 %v1443_v40, %v1398_v23  ;;  %v1494_v50 = vadd.f32 %v1455_v20, %v1407_v34  ;;  %v1610_v34 = vadd.s32 4294967224, %v1549_v10 }
 0x251   : > { %1522 = vperm.xlu0 %2208, %v1491_v43   ;;  %1525 = vperm.xlu1 %2209, %v1492_v47   ;;  %v1613_v39 = vsub.s32 %v1610_v34, %v2782_v44 }
 0x252   : > { %v1451_v45 = vpop.permute.xlu1 %1450  ;;  %v1463_v48 = vpop.permute.xlu0 %1462 }
 0x253   : > { %v1493_v32 = vadd.f32 %v1451_v45, %v1404_v19  ;;  %v1496_v4 = vadd.f32 %v1463_v48, %v1413_v1 }
 0x255   : > { %1528 = vperm.xlu0 %2208, %v1493_v32   ;;  %1531 = vperm.xlu1 %2209, %v1494_v50   ;;  %v1627_v50 = vsub.s32 %v1624_v26, %v2782_v44 }
 0x256   : > { %v1459_v35 = vpop.permute.xlu1 %1458  ;;  %v1471_v24 = vpop.permute.xlu0 %1470 }
 0x257   : > { %v1495_v51 = vadd.f32 %v1459_v35, %v1410_v31  ;;  %v1498_v52 = vadd.f32 %v1471_v24, %v1419_v38  ;;  %v1599_v31 = vsub.s32 %v1596_v36, %v2782_v44  ;;  %v1617_v38 = vadd.s32 4294967216, %v1549_v10 }
 0x259   : > { %1534 = vperm.xlu0 %2208, %v1495_v51   ;;  %1537 = vperm.xlu1 %2209, %v1496_v4   ;;  %v1620_v20 = vsub.s32 %v1617_v38, %v2782_v44 }
 0x25a   : > { %v1467_v11 = vpop.permute.xlu1 %1466 }
 0x25b   : > { %v1497_v53 = vadd.f32 %v1467_v11, %v1416_v61 }
 0x25d   : > { %1540 = vperm.xlu0 %2208, %v1497_v53   ;;  %1543 = vperm.xlu1 %2209, %v1498_v52  }
 0x25e   : > { %v1475_v55 = vpop.permute.xlu1 %1474 }
 0x25f   : > { %v1499_v56 = vadd.f32 %v1475_v55, %v1422_v29  ;;  %v1606_v29 = vsub.s32 %v1603_v22, %v2782_v44 }
 0x261   : > { %1546 = vperm.xlu0 %2208, %v1499_v56  }
 0x2c4   : > { %v1517_v57 = vpop.permute.xlu1 %1516  ;;  %v1514_v60 = vpop.permute.xlu0 %1513 }
 0x2c5   : > { %v1558_v2 = vrot.slane %v1517_v57, %v1557_v58  ;;  %v1553_v3 = vrot.slane %v1514_v60, %v1552_v59 }
 0x2c7   : > { %v1560_v14 = vsel %vm1559_vm2, %v1558_v2, %v1553_v3 }
 0x2c8   : > { %v1520_v0 = vpop.permute.xlu1 %1519 }
 0x2c9   : > { %v1565_v7 = vrot.slane %v1520_v0, %v1564_v62 }
 0x2cb   : > { %v1567_v16 = vsel %vm1566_vm3, %v1565_v7, %v1560_v14 }
 0x2cc   : > { %v1526_v12 = vpop.permute.xlu1 %1525  ;;  %v1523_v13 = vpop.permute.xlu0 %1522 }
 0x2cd   : > { %v1572_v15 = vrot.slane %v1523_v13, %v1571_v5  ;;  %v1579_v17 = vrot.slane %v1526_v12, %v1578_v8 }
 0x2cf   : > { %v1574_v23 = vsel %vm1573_vm4, %v1572_v15, %v1567_v16 }
 0x2d0   : > { %v1532_v25 = vpop.permute.xlu1 %1531  ;;  %v1529_v19 = vpop.permute.xlu0 %1528  ;;  %v1581_v1 = vsel %vm1580_vm5, %v1579_v17, %v1574_v23 }
 0x2d1   : > { %v1586_v33 = vrot.slane %v1529_v19, %v1585_v27  ;;  %v1593_v61 = vrot.slane %v1532_v25, %v1592_v21 }
 0x2d3   : > { %v1588_v18 = vsel %vm1587_vm6, %v1586_v33, %v1581_v1 }
 0x2d4   : > { %v1538_v28 = vpop.permute.xlu1 %1537  ;;  %v1535_v30 = vpop.permute.xlu0 %1534  ;;  %v1595_v40 = vsel %vm1594_vm7, %v1593_v61, %v1588_v18 }
 0x2d5   : > { %v1600_v37 = vrot.slane %v1535_v30, %v1599_v31  ;;  %v1607_v41 = vrot.slane %v1538_v28, %v1606_v29 }
 0x2d7   : > { %v1602_v47 = vsel %vm1601_vm8, %v1600_v37, %v1595_v40 }
 0x2d8   : > { %v1544_v43 = vpop.permute.xlu1 %1543  ;;  %v1541_v45 = vpop.permute.xlu0 %1540  ;;  %v1609_v35 = vsel %vm1608_vm9, %v1607_v41, %v1602_v47 }
 0x2d9   : > { %v1614_v48 = vrot.slane %v1541_v45, %v1613_v39  ;;  %v1621_v32 = vrot.slane %v1544_v43, %v1620_v20 }
 0x2db   : > { %v1616_v4 = vsel %vm1615_vm10, %v1614_v48, %v1609_v35 }
 0x2dc   : > { %v1547_v51 = vpop.permute.xlu0 %1546  ;;  %v1623_v11 = vsel %vm1622_vm11, %v1621_v32, %v1616_v4 }
 0x2dd   : > { %v1628_v24 = vrot.slane %v1547_v51, %v1627_v50 }
 0x2df   : > { %v1630_v52 = vsel %vm1629_vm12, %v1628_v24, %v1623_v11 }
 0x2e0   : > { %1633 = vst.msk [vmem:[#allocation4] sm:$0x1] %vm1632_vm13, %v1630_v52 }
 0x2e1 PF: > { %p2798_p12 = scmp.eq.s32.totalorder %s1721_s17, 1  ;;  %s2280_s14 = smov [#allocation4]  }
 0x2e2   : > { %s1643_s19 = sshll.u32 %s2280_s14, 4  ;;  %s1644_s19 = int_to_ptr.vmem [resolvable:$true] %s1643_s19 }
 0x2e3   : > { %s2210_s20 = scalar_lea.vmem %s1644_s19, 16  ;;  %s2216_s22 = scalar_lea.vmem %s1644_s19, 32 }
 0x2e4   : > { %p2211_p13 = scmp.ne.s32.totalorder %s1644_s19, %s2210_s20  ;;  %p2217_p2 = scmp.lt.s32.totalorder %s1644_s19, %s1644_s19 }
 0x2e5   : > { %p2218_p3 = scmp.lt.s32.totalorder %s2216_s22, %s2210_s20 }
 0x2e6   : > { %p2212_p0 = pnand %p2211_p13, %p2798_p12 }
 0x2e7   : > { %p2219_p4 = por %p2218_p3, %p2217_p2 }
 0x2e8   : > { %p2213_p1 = pneg %p2212_p0 }
 0x2ea   : > { %p2220_p5 = pnand %p2219_p4, %p2213_p1 }
 0x2ec   : > { %2223 = shalt.err (!%p2220_p5)
}
 0x2ed   : > { %2082 = dma.vmem_to_hbm [thread:$0]  (%p2798_p12), %s1644_s19, 16, %s2831_s3, [#allocation5]  }
 0x2ee   : > { %2255 = dma.done.wait (%p2798_p12), [#allocation5], 16  }
 0x2ef   : > { %2257 = vsyncadd (%p2798_p12), [#allocation5], 4294967280 }
 0x2f0 PF: > { %s14_s16 = sadd.s32 1, %s2276_s16   ;;  %s2851_s12 = smov %s2264_s13 }
 0x2f1   : > { %p11_p6 = scmp.ge.s32.totalorder %s14_s16, 4   ;;  %s2852_s13 = smov %s2337_s21 }
 0x2f2   : > { %s2853_s14 = smov %s2272_s15  ;;  %s2854_s15 = smov %s2856_s18 }
 0x2f3   :  { %13 = sbr.rel (!%p11_p6) target bundleno = 3 (0x3), region = 108 }
 0x2f8   :  { %1656 = vsyncpa [#allocation5], 1 }
 0x2f9   :  { %1658 = vsyncpa [#allocation5 + $0x1], 1 }

</bundles_post_ra>
